<compile_context>
chip_gen: v7x
topology: tpu7x:2x2x1
jax: 0.10.0
libtpu: 0.0.40
codegen_flags: <defaults>
</compile_context>

<pallas_src>
import functools

import jax
import jax.numpy as jnp
from jax.experimental import pallas as pl
from jax.experimental.pallas import tpu as pltpu


_VMEM_LIMIT = 32 * 1024 * 1024  # safe scoped-VMEM budget on v5e / v6e / v7x


def _pick_tile(hw, candidates=(2048, 1024, 512, 256, 128)):
    for t in candidates:
        if hw % t == 0:
            return t
    return hw


# ---------------------------------------------------------------------------
# Kernel 1: localization conv3x3(C->8) + ReLU fused with global average pool.
# grid = (B, n_spatial_tiles); the (1, 8, 1) output block is an accumulator
# across the 'arbitrary' spatial axis.
# ---------------------------------------------------------------------------
def _loc_conv_gap_kernel(cols_ref, w_ref, b_ref, g_ref, *, inv_hw):
    t = pl.program_id(1)

    @pl.when(t == 0)
    def _():
        g_ref[...] = jnp.zeros_like(g_ref)

    h = jnp.dot(w_ref[...], cols_ref[0],
                preferred_element_type=jnp.float32)           # (8, T) f32
    h = jnp.maximum(h + b_ref[...], 0.0)
    # partial GAP: sum over the lane (spatial) axis, pre-scaled by 1/(H*W)
    g_ref[...] += jnp.sum(h, axis=1, keepdims=True)[None] * inv_hw   # (1, 8, 1)


def pallas_loc_conv_gap(cols_bf16, w_bf16, b, H, W):
    B, K9C, HW = cols_bf16.shape
    Cout = w_bf16.shape[0]
    T = _pick_tile(HW)
    g = pl.pallas_call(
        functools.partial(_loc_conv_gap_kernel, inv_hw=1.0 / float(H * W)),
        out_shape=jax.ShapeDtypeStruct((B, Cout, 1), jnp.float32),
        grid=(B, HW // T),
        in_specs=[pl.BlockSpec((1, K9C, T), lambda b_, t_: (b_, 0, t_)),
                  pl.BlockSpec((Cout, K9C), lambda b_, t_: (0, 0)),
                  pl.BlockSpec((Cout, 1), lambda b_, t_: (0, 0))],
        out_specs=pl.BlockSpec((1, Cout, 1), lambda b_, t_: (b_, 0, 0)),
        compiler_params=pltpu.CompilerParams(
            dimension_semantics=("parallel", "arbitrary"),
            vmem_limit_bytes=_VMEM_LIMIT),
    )(cols_bf16, w_bf16, b)
    return g.reshape(B, Cout)


# ---------------------------------------------------------------------------
# Kernel 2: fused localization head  theta = fc2(relu(fc1(g)))  (tiny).
# ---------------------------------------------------------------------------
def _theta_kernel(g_ref, w1_ref, b1_ref, w2_ref, b2_ref, th_ref):
    h = jnp.dot(g_ref[...], w1_ref[...],
                preferred_element_type=jnp.float32) + b1_ref[...]
    h = jnp.maximum(h, 0.0)
    th_ref[...] = (jnp.dot(h, w2_ref[...], preferred_element_type=jnp.float32)
                   + b2_ref[...])


def pallas_theta_head(g, w1, b1, w2, b2):
    B, K = g.shape
    H1 = w1.shape[1]
    return pl.pallas_call(
        _theta_kernel,
        out_shape=jax.ShapeDtypeStruct((B, 6), jnp.float32),
        grid=(1,),
        in_specs=[pl.BlockSpec((B, K), lambda i: (0, 0)),
                  pl.BlockSpec((K, H1), lambda i: (0, 0)),
                  pl.BlockSpec((1, H1), lambda i: (0, 0)),
                  pl.BlockSpec((H1, 6), lambda i: (0, 0)),
                  pl.BlockSpec((1, 6), lambda i: (0, 0))],
        out_specs=pl.BlockSpec((B, 6), lambda i: (0, 0)),
        compiler_params=pltpu.CompilerParams(
            dimension_semantics=("arbitrary",)),
    )(g, w1, b1.reshape(1, -1), w2, b2.reshape(1, -1))


# ---------------------------------------------------------------------------
# Kernel 3: affine grid + bilinear grid_sample (align_corners=False, zeros
# padding), tiled over 128-lane output strips.  theta is read from SMEM.
# ---------------------------------------------------------------------------
def _grid_sample_kernel(theta_ref, base_ref, x_ref, o_ref, *, H, W):
    b = pl.program_id(0)
    HW = H * W

    # theta scalars from SMEM (scalar unit; frees vector slots).
    t00 = theta_ref[b, 0]; t01 = theta_ref[b, 1]; t02 = theta_ref[b, 2]
    t10 = theta_ref[b, 3]; t11 = theta_ref[b, 4]; t12 = theta_ref[b, 5]

    xb = base_ref[0:1, :]                       # (1, T) normalized x of this strip
    yb = base_ref[1:2, :]                       # (1, T) normalized y
    T = xb.shape[-1]

    gx = t00 * xb + t01 * yb + t02
    gy = t10 * xb + t11 * yb + t12

    # Un-normalize (align_corners=False convention).
    ix = ((gx + 1.0) * W - 1.0) * 0.5
    iy = ((gy + 1.0) * H - 1.0) * 0.5

    x0f = jnp.floor(ix)
    y0f = jnp.floor(iy)
    wx1 = ix - x0f
    wx0 = 1.0 - wx1
    wy1 = iy - y0f
    wy0 = 1.0 - wy1
    x0 = x0f.astype(jnp.int32)
    y0 = y0f.astype(jnp.int32)
    x1 = x0 + 1
    y1 = y0 + 1

    in_iota = jax.lax.broadcasted_iota(jnp.int32, (HW, T), 0)  # input flat idx

    def corner(xc, yc, w):
        valid = (xc >= 0) & (xc < W) & (yc >= 0) & (yc < H)
        cidx = jnp.where(valid, yc * W + xc, -1)   # -1 never matches -> zeros pad
        return jnp.where(in_iota == cidx, w, 0.0)  # (HW_in, T)

    # Accumulate the 4 corner contributions in place (one live (HW,T) buffer).
    mt = corner(x0, y0, wy0 * wx0)
    mt = mt + corner(x1, y0, wy0 * wx1)
    mt = mt + corner(x0, y1, wy1 * wx0)
    mt = mt + corner(x1, y1, wy1 * wx1)

    o_ref[0] = jnp.dot(x_ref[0], mt,
                       preferred_element_type=jnp.float32).astype(o_ref.dtype)


def pallas_affine_grid_sample(theta, x_flat, H, W):
    """theta: (B, 6); x_flat: (B, C, H*W) f32 -> resampled (B, C, H*W)."""
    B, C, HW = x_flat.shape
    T = 128 if HW % 128 == 0 else HW
    # Base normalized grid (align_corners=False), flat idx = i*W + j.
    js = (2.0 * jnp.arange(W, dtype=jnp.float32) + 1.0) / W - 1.0
    iis = (2.0 * jnp.arange(H, dtype=jnp.float32) + 1.0) / H - 1.0
    base = jnp.stack([jnp.tile(js, H), jnp.repeat(iis, W)], axis=0)  # (2, HW)
    return pl.pallas_call(
        functools.partial(_grid_sample_kernel, H=H, W=W),
        out_shape=jax.ShapeDtypeStruct((B, C, HW), jnp.float32),
        grid=(B, HW // T),
        in_specs=[pl.BlockSpec(memory_space=pltpu.MemorySpace.SMEM),  # theta
                  pl.BlockSpec((2, T), lambda b_, t_: (0, t_)),
                  pl.BlockSpec((1, C, HW), lambda b_, t_: (b_, 0, 0))],
        out_specs=pl.BlockSpec((1, C, T), lambda b_, t_: (b_, 0, t_)),
        compiler_params=pltpu.CompilerParams(
            dimension_semantics=("parallel", "parallel"),
            vmem_limit_bytes=_VMEM_LIMIT),
    )(theta, base, x_flat)


# ---------------------------------------------------------------------------
# Kernel 4: UNet head, fused conv3x3(9C->16)+ReLU -> 1x1(16->out) -> sigmoid.
# Lane-dense (1, out, T) output blocks.
# ---------------------------------------------------------------------------
def _unet_fused_kernel(cols_ref, w1_ref, b1_ref, w2_ref, b2_ref, o_ref):
    h = jnp.dot(w1_ref[...], cols_ref[0],
                preferred_element_type=jnp.float32)            # (16, T) f32
    h = jnp.maximum(h + b1_ref[...], 0.0)
    logit = jnp.dot(w2_ref[...], h,
                    preferred_element_type=jnp.float32) + b2_ref[...]  # (out, T)
    o_ref[0] = jax.nn.sigmoid(logit).astype(o_ref.dtype)


def pallas_unet_head(cols_bf16, w1_bf16, b1, w2, b2):
    B, K9C, HW = cols_bf16.shape
    C1 = w1_bf16.shape[0]
    Cout = w2.shape[0]
    T = _pick_tile(HW)
    return pl.pallas_call(
        _unet_fused_kernel,
        out_shape=jax.ShapeDtypeStruct((B, Cout, HW), jnp.float32),
        grid=(B, HW // T),
        in_specs=[pl.BlockSpec((1, K9C, T), lambda b_, t_: (b_, 0, t_)),
                  pl.BlockSpec((C1, K9C), lambda b_, t_: (0, 0)),
                  pl.BlockSpec((C1, 1), lambda b_, t_: (0, 0)),
                  pl.BlockSpec((Cout, C1), lambda b_, t_: (0, 0)),
                  pl.BlockSpec((Cout, 1), lambda b_, t_: (0, 0))],
        out_specs=pl.BlockSpec((1, Cout, T), lambda b_, t_: (b_, 0, t_)),
        compiler_params=pltpu.CompilerParams(
            dimension_semantics=("parallel", "parallel"),
            vmem_limit_bytes=_VMEM_LIMIT),
    )(cols_bf16, w1_bf16, b1, w2, b2)


# ---------------------------------------------------------------------------
# Glue: channel-major im2col (no NHWC transpose needed; GEMMs stay in Pallas).
# ---------------------------------------------------------------------------
def _im2col_3x3_cmajor(x_nchw):
    """x: (B, C, H, W) -> (B, 9*C, H*W) zero-padded 3x3 patches, channel-major."""
    B, C, H, W = x_nchw.shape
    xp = jnp.pad(x_nchw, ((0, 0), (0, 0), (1, 1), (1, 1)))
    taps = [xp[:, :, di:di + H, dj:dj + W] for di in range(3) for dj in range(3)]
    return jnp.concatenate(taps, axis=1).reshape(B, 9 * C, H * W)


# ---------------------------------------------------------------------------
# Module forward
# ---------------------------------------------------------------------------
def stn_forward(x_nchw, p):
    B, C, H, W = x_nchw.shape
    HW = H * W
    cols = _im2col_3x3_cmajor(x_nchw).astype(jnp.bfloat16)      # bf16 MXU operands
    g = pallas_loc_conv_gap(cols, p["conv_w"], p["conv_b"], H, W)          # (B, 8)
    theta = pallas_theta_head(g, p["fc1_w"], p["fc1_b"],
                              p["fc2_w"], p["fc2_b"])                      # (B, 6)
    y = pallas_affine_grid_sample(theta, x_nchw.reshape(B, C, HW), H, W)   # f32
    return y.reshape(B, C, H, W)


def unet_forward(x_nchw, p):
    B, C, H, W = x_nchw.shape
    cols = _im2col_3x3_cmajor(x_nchw).astype(jnp.bfloat16)
    out = pallas_unet_head(cols, p["c1_w"], p["c1_b"], p["c2_w"], p["c2_b"])
    return out.reshape(B, -1, H, W)                                        # NCHW


def stn_decoder_forward(x, params, normalize=False):
    if normalize:
        x = (x - 0.5) * 2.0   # glue-level elementwise preprocessing
    for stn_p in params["stns"]:
        x = stn_forward(x, stn_p)
    return unet_forward(x, params["unet"])


# ---------------------------------------------------------------------------
# Deterministic synthetic parameters (kernel-friendly layouts)
# ---------------------------------------------------------------------------
def init_params(key, C, out_channels=1, num_stn=1):
    params = {"stns": [], "unet": {}}
    k = key
    for _ in range(num_stn):
        k, k1, k2, k3 = jax.random.split(k, 4)
        params["stns"].append({
            "conv_w": (jax.random.normal(k1, (8, 9 * C), jnp.float32) * 0.1
                       ).astype(jnp.bfloat16),
            "conv_b": jnp.zeros((8, 1), jnp.float32),
            "fc1_w": jax.random.normal(k2, (8, 32), jnp.float32) * 0.1,
            "fc1_b": jnp.zeros((32,), jnp.float32),
            "fc2_w": jax.random.normal(k3, (32, 6), jnp.float32) * 0.01,
            # identity affine-transform bias init (standard STN init)
            "fc2_b": jnp.array([1.0, 0.0, 0.0, 0.0, 1.0, 0.0], jnp.float32),
        })
    k, k4, k5 = jax.random.split(k, 3)
    params["unet"] = {
        "c1_w": (jax.random.normal(k4, (16, 9 * C), jnp.float32) * 0.1
                 ).astype(jnp.bfloat16),
        "c1_b": jnp.zeros((16, 1), jnp.float32),
        "c2_w": jax.random.normal(k5, (out_channels, 16), jnp.float32) * 0.1,
        "c2_b": jnp.zeros((out_channels, 1), jnp.float32),
    }
    return params


if __name__ == "__main__":
    key = jax.random.PRNGKey(0)
    kx, kp = jax.random.split(key)
    B, C, H, W = 2, 4, 16, 16
    x = jax.random.uniform(kx, (B, C, H, W), dtype=jnp.float32)   # NCHW (PyTorch)
    params = init_params(kp, C=C, out_channels=1, num_stn=1)

    fwd = jax.jit(lambda x_, p_: stn_decoder_forward(x_, p_, normalize=True))
    out = fwd(x, params)
    out = jax.block_until_ready(out)

    assert out.shape == (B, 1, H, W), out.shape
    assert bool(jnp.all(jnp.isfinite(out)))
    assert bool(jnp.all((out >= 0.0) & (out <= 1.0)))   # sigmoid-activated logit
    print("KERNEL_OK")
</pallas_src>

<mosaic_0001>
module attributes {stable_mosaic.version = 11 : i64} {
  func.func @_loc_conv_gap_kernel(%arg0: i32, %arg1: i32, %arg2: memref<1x36x256xbf16, #tpu.memory_space<vmem>>, %arg3: memref<8x36xbf16, #tpu.memory_space<vmem>>, %arg4: memref<8x1xf32, #tpu.memory_space<vmem>>, %arg5: memref<1x8x1xf32, #tpu.memory_space<vmem>>) attributes {dimension_semantics = [#tpu.dimension_semantics<parallel>, #tpu.dimension_semantics<arbitrary>], iteration_bounds = array<i64: 2, 1>, scalar_prefetch = 0 : i64, scratch_operands = 0 : i64, tpu.core_type = #tpu.core_type<tc>, window_params = [{transform_indices = @transform_0, window_bounds = array<i64: 1, 36, 256>}, {pipeline_mode = #tpu.pipeline_mode<synchronous>, transform_indices = @transform_1, window_bounds = array<i64: 8, 36>}, {pipeline_mode = #tpu.pipeline_mode<synchronous>, transform_indices = @transform_2, window_bounds = array<i64: 8, 1>}, {transform_indices = @transform_3, window_bounds = array<i64: 1, 8, 1>}]} {
    %c0_i32 = arith.constant 0 : i32
    %0 = arith.cmpi eq, %arg1, %c0_i32 : i32
    %1 = arith.extui %0 : i1 to i32
    %c0_i32_0 = arith.constant 0 : i32
    %2 = arith.cmpi ne, %1, %c0_i32_0 : i32
    scf.if %2 {
      %cst_16 = arith.constant 0.000000e+00 : f32
      %20 = vector.broadcast %cst_16 : f32 to vector<1x8x1xf32>
      %c0_17 = arith.constant 0 : index
      %c0_18 = arith.constant 0 : index
      %c0_19 = arith.constant 0 : index
      %21 = vector.load %arg5[%c0_17, %c0_18, %c0_19] : memref<1x8x1xf32, #tpu.memory_space<vmem>>, vector<1x8x1xf32>
      tpu.vector_store %arg5[%c0_17, %c0_18, %c0_19], %20 {strides = array<i32>} : memref<1x8x1xf32, #tpu.memory_space<vmem>>, vector<1x8x1xf32>,
    } else {
    }
    %c0 = arith.constant 0 : index
    %c0_1 = arith.constant 0 : index
    %3 = vector.load %arg3[%c0, %c0_1] : memref<8x36xbf16, #tpu.memory_space<vmem>>, vector<8x36xbf16>
    %c0_2 = arith.constant 0 : index
    %c0_3 = arith.constant 0 : index
    %c0_4 = arith.constant 0 : index
    %4 = vector.load %arg2[%c0_2, %c0_3, %c0_4] : memref<1x36x256xbf16, #tpu.memory_space<vmem>>, vector<1x36x256xbf16>
    %5 = vector.shape_cast %4 : vector<1x36x256xbf16> to vector<36x256xbf16>
    %cst = arith.constant dense<0.000000e+00> : vector<8x256xf32>
    %6 = tpu.matmul %3, %5, %cst {dimension_numbers = #tpu.dot_dimension_numbers<[1], [0], [0], [1], [0, 0, 1, 1], [], []>} : vector<8x36xbf16>, vector<36x256xbf16>, vector<8x256xf32> -> vector<8x256xf32>
    %c0_5 = arith.constant 0 : index
    %c0_6 = arith.constant 0 : index
    %7 = vector.load %arg4[%c0_5, %c0_6] : memref<8x1xf32, #tpu.memory_space<vmem>>, vector<8x1xf32>
    %8 = vector.broadcast %7 : vector<8x1xf32> to vector<8x256xf32>
    %9 = arith.addf %6, %8 : vector<8x256xf32>
    %cst_7 = arith.constant 0.000000e+00 : f32
    %10 = vector.broadcast %cst_7 : f32 to vector<8x256xf32>
    %11 = arith.maximumf %9, %10 : vector<8x256xf32>
    %c0_8 = arith.constant 0 : index
    %c0_9 = arith.constant 0 : index
    %c0_10 = arith.constant 0 : index
    %12 = vector.load %arg5[%c0_8, %c0_9, %c0_10] : memref<1x8x1xf32, #tpu.memory_space<vmem>>, vector<1x8x1xf32>
    %cst_11 = arith.constant dense<0.000000e+00> : vector<8xf32>
    %13 = vector.multi_reduction <add>, %11, %cst_11 [1] : vector<8x256xf32> to vector<8xf32>
    %14 = vector.shape_cast %13 : vector<8xf32> to vector<8x1xf32>
    %15 = vector.shape_cast %14 : vector<8x1xf32> to vector<1x8x1xf32>
    %cst_12 = arith.constant 3.906250e-03 : f32
    %16 = vector.broadcast %cst_12 : f32 to vector<1x8x1xf32>
    %17 = arith.mulf %15, %16 : vector<1x8x1xf32>
    %18 = arith.addf %12, %17 : vector<1x8x1xf32>
    %c0_13 = arith.constant 0 : index
    %c0_14 = arith.constant 0 : index
    %c0_15 = arith.constant 0 : index
    %19 = vector.load %arg5[%c0_13, %c0_14, %c0_15] : memref<1x8x1xf32, #tpu.memory_space<vmem>>, vector<1x8x1xf32>
    tpu.vector_store %arg5[%c0_13, %c0_14, %c0_15], %18 {strides = array<i32>} : memref<1x8x1xf32, #tpu.memory_space<vmem>>, vector<1x8x1xf32>,
    return
  }
  func.func @transform_0(%arg0: i32, %arg1: i32) -> (i32, i32, i32) {
    %c0_i32 = arith.constant 0 : i32
    %c0_i32_0 = arith.constant 0 : i32
    return %arg0, %c0_i32, %arg1 : i32, i32, i32
  }
  func.func @transform_1(%arg0: i32, %arg1: i32) -> (i32, i32) {
    %c0_i32 = arith.constant 0 : i32
    %c0_i32_0 = arith.constant 0 : i32
    %c0_i32_1 = arith.constant 0 : i32
    return %c0_i32, %c0_i32_0 : i32, i32
  }
  func.func @transform_2(%arg0: i32, %arg1: i32) -> (i32, i32) {
    %c0_i32 = arith.constant 0 : i32
    %c0_i32_0 = arith.constant 0 : i32
    %c0_i32_1 = arith.constant 0 : i32
    return %c0_i32, %c0_i32_0 : i32, i32
  }
  func.func @transform_3(%arg0: i32, %arg1: i32) -> (i32, i32, i32) {
    %c0_i32 = arith.constant 0 : i32
    %c0_i32_0 = arith.constant 0 : i32
    %c0_i32_1 = arith.constant 0 : i32
    return %arg0, %c0_i32, %c0_i32_0 : i32, i32, i32
  }
}

module attributes {stable_mosaic.version = 11 : i64} {
  func.func @_theta_kernel(%arg0: i32, %arg1: memref<2x8xf32, #tpu.memory_space<vmem>>, %arg2: memref<8x32xf32, #tpu.memory_space<vmem>>, %arg3: memref<1x32xf32, #tpu.memory_space<vmem>>, %arg4: memref<32x6xf32, #tpu.memory_space<vmem>>, %arg5: memref<1x6xf32, #tpu.memory_space<vmem>>, %arg6: memref<2x6xf32, #tpu.memory_space<vmem>>) attributes {dimension_semantics = [#tpu.dimension_semantics<arbitrary>], iteration_bounds = array<i64: 1>, scalar_prefetch = 0 : i64, scratch_operands = 0 : i64, tpu.core_type = #tpu.core_type<tc>, window_params = [{pipeline_mode = #tpu.pipeline_mode<synchronous>, transform_indices = @transform_0, window_bounds = array<i64: 2, 8>}, {pipeline_mode = #tpu.pipeline_mode<synchronous>, transform_indices = @transform_1, window_bounds = array<i64: 8, 32>}, {pipeline_mode = #tpu.pipeline_mode<synchronous>, transform_indices = @transform_2, window_bounds = array<i64: 1, 32>}, {pipeline_mode = #tpu.pipeline_mode<synchronous>, transform_indices = @transform_3, window_bounds = array<i64: 32, 6>}, {pipeline_mode = #tpu.pipeline_mode<synchronous>, transform_indices = @transform_4, window_bounds = array<i64: 1, 6>}, {pipeline_mode = #tpu.pipeline_mode<synchronous>, transform_indices = @transform_5, window_bounds = array<i64: 2, 6>}]} {
    %c0 = arith.constant 0 : index
    %c0_0 = arith.constant 0 : index
    %0 = vector.load %arg1[%c0, %c0_0] : memref<2x8xf32, #tpu.memory_space<vmem>>, vector<2x8xf32>
    %c0_1 = arith.constant 0 : index
    %c0_2 = arith.constant 0 : index
    %1 = vector.load %arg2[%c0_1, %c0_2] : memref<8x32xf32, #tpu.memory_space<vmem>>, vector<8x32xf32>
    %cst = arith.constant dense<0.000000e+00> : vector<2x32xf32>
    %2 = tpu.matmul %0, %1, %cst {dimension_numbers = #tpu.dot_dimension_numbers<[1], [0], [0], [1], [0, 0, 1, 1], [], []>} : vector<2x8xf32>, vector<8x32xf32>, vector<2x32xf32> -> vector<2x32xf32>
    %c0_3 = arith.constant 0 : index
    %c0_4 = arith.constant 0 : index
    %3 = vector.load %arg3[%c0_3, %c0_4] : memref<1x32xf32, #tpu.memory_space<vmem>>, vector<1x32xf32>
    %4 = vector.broadcast %3 : vector<1x32xf32> to vector<2x32xf32>
    %5 = arith.addf %2, %4 : vector<2x32xf32>
    %cst_5 = arith.constant 0.000000e+00 : f32
    %6 = vector.broadcast %cst_5 : f32 to vector<2x32xf32>
    %7 = arith.maximumf %5, %6 : vector<2x32xf32>
    %c0_6 = arith.constant 0 : index
    %c0_7 = arith.constant 0 : index
    %8 = vector.load %arg4[%c0_6, %c0_7] : memref<32x6xf32, #tpu.memory_space<vmem>>, vector<32x6xf32>
    %cst_8 = arith.constant dense<0.000000e+00> : vector<2x6xf32>
    %9 = tpu.matmul %7, %8, %cst_8 {dimension_numbers = #tpu.dot_dimension_numbers<[1], [0], [0], [1], [0, 0, 1, 1], [], []>} : vector<2x32xf32>, vector<32x6xf32>, vector<2x6xf32> -> vector<2x6xf32>
    %c0_9 = arith.constant 0 : index
    %c0_10 = arith.constant 0 : index
    %10 = vector.load %arg5[%c0_9, %c0_10] : memref<1x6xf32, #tpu.memory_space<vmem>>, vector<1x6xf32>
    %11 = vector.broadcast %10 : vector<1x6xf32> to vector<2x6xf32>
    %12 = arith.addf %9, %11 : vector<2x6xf32>
    %c0_11 = arith.constant 0 : index
    %c0_12 = arith.constant 0 : index
    %13 = vector.load %arg6[%c0_11, %c0_12] : memref<2x6xf32, #tpu.memory_space<vmem>>, vector<2x6xf32>
    tpu.vector_store %arg6[%c0_11, %c0_12], %12 {strides = array<i32>} : memref<2x6xf32, #tpu.memory_space<vmem>>, vector<2x6xf32>,
    return
  }
  func.func @transform_0(%arg0: i32) -> (i32, i32) {
    %c0_i32 = arith.constant 0 : i32
    %c0_i32_0 = arith.constant 0 : i32
    %c0_i32_1 = arith.constant 0 : i32
    return %c0_i32, %c0_i32_0 : i32, i32
  }
  func.func @transform_1(%arg0: i32) -> (i32, i32) {
    %c0_i32 = arith.constant 0 : i32
    %c0_i32_0 = arith.constant 0 : i32
    %c0_i32_1 = arith.constant 0 : i32
    return %c0_i32, %c0_i32_0 : i32, i32
  }
  func.func @transform_2(%arg0: i32) -> (i32, i32) {
    %c0_i32 = arith.constant 0 : i32
    %c0_i32_0 = arith.constant 0 : i32
    %c0_i32_1 = arith.constant 0 : i32
    return %c0_i32, %c0_i32_0 : i32, i32
  }
  func.func @transform_3(%arg0: i32) -> (i32, i32) {
    %c0_i32 = arith.constant 0 : i32
    %c0_i32_0 = arith.constant 0 : i32
    %c0_i32_1 = arith.constant 0 : i32
    return %c0_i32, %c0_i32_0 : i32, i32
  }
  func.func @transform_4(%arg0: i32) -> (i32, i32) {
    %c0_i32 = arith.constant 0 : i32
    %c0_i32_0 = arith.constant 0 : i32
    %c0_i32_1 = arith.constant 0 : i32
    return %c0_i32, %c0_i32_0 : i32, i32
  }
  func.func @transform_5(%arg0: i32) -> (i32, i32) {
    %c0_i32 = arith.constant 0 : i32
    %c0_i32_0 = arith.constant 0 : i32
    %c0_i32_1 = arith.constant 0 : i32
    return %c0_i32, %c0_i32_0 : i32, i32
  }
}

module attributes {stable_mosaic.version = 11 : i64} {
  func.func @_grid_sample_kernel(%arg0: i32, %arg1: i32, %arg2: memref<2x6xf32, #tpu.memory_space<smem>>, %arg3: memref<2x128xf32, #tpu.memory_space<vmem>>, %arg4: memref<1x4x256xf32, #tpu.memory_space<vmem>>, %arg5: memref<1x4x128xf32, #tpu.memory_space<vmem>>) attributes {dimension_semantics = [#tpu.dimension_semantics<parallel>, #tpu.dimension_semantics<parallel>], iteration_bounds = array<i64: 2, 2>, scalar_prefetch = 0 : i64, scratch_operands = 0 : i64, tpu.core_type = #tpu.core_type<tc>, window_params = [{transform_indices = @transform_0, window_bounds = array<i64: 2, 6>}, {transform_indices = @transform_1, window_bounds = array<i64: 2, 128>}, {transform_indices = @transform_2, window_bounds = array<i64: 1, 4, 256>}, {transform_indices = @transform_3, window_bounds = array<i64: 1, 4, 128>}]} {
    %0 = arith.index_cast %arg0 : i32 to index
    %c0 = arith.constant 0 : index
    %1 = memref.load %arg2[%0, %c0] : memref<2x6xf32, #tpu.memory_space<smem>>
    %2 = arith.index_cast %arg0 : i32 to index
    %c1 = arith.constant 1 : index
    %3 = memref.load %arg2[%2, %c1] : memref<2x6xf32, #tpu.memory_space<smem>>
    %4 = arith.index_cast %arg0 : i32 to index
    %c2 = arith.constant 2 : index
    %5 = memref.load %arg2[%4, %c2] : memref<2x6xf32, #tpu.memory_space<smem>>
    %6 = arith.index_cast %arg0 : i32 to index
    %c3 = arith.constant 3 : index
    %7 = memref.load %arg2[%6, %c3] : memref<2x6xf32, #tpu.memory_space<smem>>
    %8 = arith.index_cast %arg0 : i32 to index
    %c4 = arith.constant 4 : index
    %9 = memref.load %arg2[%8, %c4] : memref<2x6xf32, #tpu.memory_space<smem>>
    %10 = arith.index_cast %arg0 : i32 to index
    %c5 = arith.constant 5 : index
    %11 = memref.load %arg2[%10, %c5] : memref<2x6xf32, #tpu.memory_space<smem>>
    %c0_0 = arith.constant 0 : index
    %c0_1 = arith.constant 0 : index
    %12 = vector.load %arg3[%c0_0, %c0_1] : memref<2x128xf32, #tpu.memory_space<vmem>>, vector<1x128xf32>
    %c1_2 = arith.constant 1 : index
    %c0_3 = arith.constant 0 : index
    %13 = vector.load %arg3[%c1_2, %c0_3] : memref<2x128xf32, #tpu.memory_space<vmem>>, vector<1x128xf32>
    %14 = vector.broadcast %1 : f32 to vector<1x128xf32>
    %15 = arith.mulf %14, %12 : vector<1x128xf32>
    %16 = vector.broadcast %3 : f32 to vector<1x128xf32>
    %17 = arith.mulf %16, %13 : vector<1x128xf32>
    %18 = arith.addf %15, %17 : vector<1x128xf32>
    %19 = vector.broadcast %5 : f32 to vector<1x128xf32>
    %20 = arith.addf %18, %19 : vector<1x128xf32>
    %21 = vector.broadcast %7 : f32 to vector<1x128xf32>
    %22 = arith.mulf %21, %12 : vector<1x128xf32>
    %23 = vector.broadcast %9 : f32 to vector<1x128xf32>
    %24 = arith.mulf %23, %13 : vector<1x128xf32>
    %25 = arith.addf %22, %24 : vector<1x128xf32>
    %26 = vector.broadcast %11 : f32 to vector<1x128xf32>
    %27 = arith.addf %25, %26 : vector<1x128xf32>
    %cst = arith.constant 1.000000e+00 : f32
    %28 = vector.broadcast %cst : f32 to vector<1x128xf32>
    %29 = arith.addf %20, %28 : vector<1x128xf32>
    %cst_4 = arith.constant 1.600000e+01 : f32
    %30 = vector.broadcast %cst_4 : f32 to vector<1x128xf32>
    %31 = arith.mulf %29, %30 : vector<1x128xf32>
    %cst_5 = arith.constant 1.000000e+00 : f32
    %32 = vector.broadcast %cst_5 : f32 to vector<1x128xf32>
    %33 = arith.subf %31, %32 : vector<1x128xf32>
    %cst_6 = arith.constant 5.000000e-01 : f32
    %34 = vector.broadcast %cst_6 : f32 to vector<1x128xf32>
    %35 = arith.mulf %33, %34 : vector<1x128xf32>
    %cst_7 = arith.constant 1.000000e+00 : f32
    %36 = vector.broadcast %cst_7 : f32 to vector<1x128xf32>
    %37 = arith.addf %27, %36 : vector<1x128xf32>
    %cst_8 = arith.constant 1.600000e+01 : f32
    %38 = vector.broadcast %cst_8 : f32 to vector<1x128xf32>
    %39 = arith.mulf %37, %38 : vector<1x128xf32>
    %cst_9 = arith.constant 1.000000e+00 : f32
    %40 = vector.broadcast %cst_9 : f32 to vector<1x128xf32>
    %41 = arith.subf %39, %40 : vector<1x128xf32>
    %cst_10 = arith.constant 5.000000e-01 : f32
    %42 = vector.broadcast %cst_10 : f32 to vector<1x128xf32>
    %43 = arith.mulf %41, %42 : vector<1x128xf32>
    %44 = math.floor %35 : vector<1x128xf32>
    %45 = math.floor %43 : vector<1x128xf32>
    %46 = arith.subf %35, %44 : vector<1x128xf32>
    %cst_11 = arith.constant 1.000000e+00 : f32
    %47 = vector.broadcast %cst_11 : f32 to vector<1x128xf32>
    %48 = arith.subf %47, %46 : vector<1x128xf32>
    %49 = arith.subf %43, %45 : vector<1x128xf32>
    %cst_12 = arith.constant 1.000000e+00 : f32
    %50 = vector.broadcast %cst_12 : f32 to vector<1x128xf32>
    %51 = arith.subf %50, %49 : vector<1x128xf32>
    %52 = arith.fptosi %44 : vector<1x128xf32> to vector<1x128xi32>
    %53 = arith.fptosi %45 : vector<1x128xf32> to vector<1x128xi32>
    %c1_i32 = arith.constant 1 : i32
    %54 = vector.broadcast %c1_i32 : i32 to vector<1x128xi32>
    %55 = arith.addi %52, %54 : vector<1x128xi32>
    %c1_i32_13 = arith.constant 1 : i32
    %56 = vector.broadcast %c1_i32_13 : i32 to vector<1x128xi32>
    %57 = arith.addi %53, %56 : vector<1x128xi32>
    %58 = tpu.iota {dimensions = array<i32: 0>} : vector<256x128xi32>
    %59 = arith.mulf %51, %48 : vector<1x128xf32>
    %c0_i32 = arith.constant 0 : i32
    %60 = vector.broadcast %c0_i32 : i32 to vector<1x128xi32>
    %61 = arith.cmpi sge, %52, %60 : vector<1x128xi32>
    %c16_i32 = arith.constant 16 : i32
    %62 = vector.broadcast %c16_i32 : i32 to vector<1x128xi32>
    %63 = arith.cmpi slt, %52, %62 : vector<1x128xi32>
    %64 = arith.andi %61, %63 : vector<1x128xi1>
    %c0_i32_14 = arith.constant 0 : i32
    %65 = vector.broadcast %c0_i32_14 : i32 to vector<1x128xi32>
    %66 = arith.cmpi sge, %53, %65 : vector<1x128xi32>
    %67 = arith.andi %64, %66 : vector<1x128xi1>
    %c16_i32_15 = arith.constant 16 : i32
    %68 = vector.broadcast %c16_i32_15 : i32 to vector<1x128xi32>
    %69 = arith.cmpi slt, %53, %68 : vector<1x128xi32>
    %70 = arith.andi %67, %69 : vector<1x128xi1>
    %c16_i32_16 = arith.constant 16 : i32
    %71 = vector.broadcast %c16_i32_16 : i32 to vector<1x128xi32>
    %72 = arith.muli %53, %71 : vector<1x128xi32>
    %73 = arith.addi %72, %52 : vector<1x128xi32>
    %c-1_i32 = arith.constant -1 : i32
    %74 = vector.broadcast %c-1_i32 : i32 to vector<1x128xi32>
    %75 = arith.select %70, %73, %74 : vector<1x128xi1>, vector<1x128xi32>
    %76 = vector.broadcast %75 : vector<1x128xi32> to vector<256x128xi32>
    %77 = arith.cmpi eq, %58, %76 : vector<256x128xi32>
    %cst_17 = arith.constant 0.000000e+00 : f32
    %78 = vector.shape_cast %59 : vector<1x128xf32> to vector<1x128xf32>
    %79 = vector.broadcast %78 : vector<1x128xf32> to vector<256x128xf32>
    %80 = vector.broadcast %cst_17 : f32 to vector<256x128xf32>
    %81 = arith.select %77, %79, %80 : vector<256x128xi1>, vector<256x128xf32>
    %82 = arith.mulf %51, %46 : vector<1x128xf32>
    %c0_i32_18 = arith.constant 0 : i32
    %83 = vector.broadcast %c0_i32_18 : i32 to vector<1x128xi32>
    %84 = arith.cmpi sge, %55, %83 : vector<1x128xi32>
    %c16_i32_19 = arith.constant 16 : i32
    %85 = vector.broadcast %c16_i32_19 : i32 to vector<1x128xi32>
    %86 = arith.cmpi slt, %55, %85 : vector<1x128xi32>
    %87 = arith.andi %84, %86 : vector<1x128xi1>
    %c0_i32_20 = arith.constant 0 : i32
    %88 = vector.broadcast %c0_i32_20 : i32 to vector<1x128xi32>
    %89 = arith.cmpi sge, %53, %88 : vector<1x128xi32>
    %90 = arith.andi %87, %89 : vector<1x128xi1>
    %c16_i32_21 = arith.constant 16 : i32
    %91 = vector.broadcast %c16_i32_21 : i32 to vector<1x128xi32>
    %92 = arith.cmpi slt, %53, %91 : vector<1x128xi32>
    %93 = arith.andi %90, %92 : vector<1x128xi1>
    %c16_i32_22 = arith.constant 16 : i32
    %94 = vector.broadcast %c16_i32_22 : i32 to vector<1x128xi32>
    %95 = arith.muli %53, %94 : vector<1x128xi32>
    %96 = arith.addi %95, %55 : vector<1x128xi32>
    %c-1_i32_23 = arith.constant -1 : i32
    %97 = vector.broadcast %c-1_i32_23 : i32 to vector<1x128xi32>
    %98 = arith.select %93, %96, %97 : vector<1x128xi1>, vector<1x128xi32>
    %99 = vector.broadcast %98 : vector<1x128xi32> to vector<256x128xi32>
    %100 = arith.cmpi eq, %58, %99 : vector<256x128xi32>
    %cst_24 = arith.constant 0.000000e+00 : f32
    %101 = vector.shape_cast %82 : vector<1x128xf32> to vector<1x128xf32>
    %102 = vector.broadcast %101 : vector<1x128xf32> to vector<256x128xf32>
    %103 = vector.broadcast %cst_24 : f32 to vector<256x128xf32>
    %104 = arith.select %100, %102, %103 : vector<256x128xi1>, vector<256x128xf32>
    %105 = arith.addf %81, %104 : vector<256x128xf32>
    %106 = arith.mulf %49, %48 : vector<1x128xf32>
    %c0_i32_25 = arith.constant 0 : i32
    %107 = vector.broadcast %c0_i32_25 : i32 to vector<1x128xi32>
    %108 = arith.cmpi sge, %52, %107 : vector<1x128xi32>
    %c16_i32_26 = arith.constant 16 : i32
    %109 = vector.broadcast %c16_i32_26 : i32 to vector<1x128xi32>
    %110 = arith.cmpi slt, %52, %109 : vector<1x128xi32>
    %111 = arith.andi %108, %110 : vector<1x128xi1>
    %c0_i32_27 = arith.constant 0 : i32
    %112 = vector.broadcast %c0_i32_27 : i32 to vector<1x128xi32>
    %113 = arith.cmpi sge, %57, %112 : vector<1x128xi32>
    %114 = arith.andi %111, %113 : vector<1x128xi1>
    %c16_i32_28 = arith.constant 16 : i32
    %115 = vector.broadcast %c16_i32_28 : i32 to vector<1x128xi32>
    %116 = arith.cmpi slt, %57, %115 : vector<1x128xi32>
    %117 = arith.andi %114, %116 : vector<1x128xi1>
    %c16_i32_29 = arith.constant 16 : i32
    %118 = vector.broadcast %c16_i32_29 : i32 to vector<1x128xi32>
    %119 = arith.muli %57, %118 : vector<1x128xi32>
    %120 = arith.addi %119, %52 : vector<1x128xi32>
    %c-1_i32_30 = arith.constant -1 : i32
    %121 = vector.broadcast %c-1_i32_30 : i32 to vector<1x128xi32>
    %122 = arith.select %117, %120, %121 : vector<1x128xi1>, vector<1x128xi32>
    %123 = vector.broadcast %122 : vector<1x128xi32> to vector<256x128xi32>
    %124 = arith.cmpi eq, %58, %123 : vector<256x128xi32>
    %cst_31 = arith.constant 0.000000e+00 : f32
    %125 = vector.shape_cast %106 : vector<1x128xf32> to vector<1x128xf32>
    %126 = vector.broadcast %125 : vector<1x128xf32> to vector<256x128xf32>
    %127 = vector.broadcast %cst_31 : f32 to vector<256x128xf32>
    %128 = arith.select %124, %126, %127 : vector<256x128xi1>, vector<256x128xf32>
    %129 = arith.addf %105, %128 : vector<256x128xf32>
    %130 = arith.mulf %49, %46 : vector<1x128xf32>
    %c0_i32_32 = arith.constant 0 : i32
    %131 = vector.broadcast %c0_i32_32 : i32 to vector<1x128xi32>
    %132 = arith.cmpi sge, %55, %131 : vector<1x128xi32>
    %c16_i32_33 = arith.constant 16 : i32
    %133 = vector.broadcast %c16_i32_33 : i32 to vector<1x128xi32>
    %134 = arith.cmpi slt, %55, %133 : vector<1x128xi32>
    %135 = arith.andi %132, %134 : vector<1x128xi1>
    %c0_i32_34 = arith.constant 0 : i32
    %136 = vector.broadcast %c0_i32_34 : i32 to vector<1x128xi32>
    %137 = arith.cmpi sge, %57, %136 : vector<1x128xi32>
    %138 = arith.andi %135, %137 : vector<1x128xi1>
    %c16_i32_35 = arith.constant 16 : i32
    %139 = vector.broadcast %c16_i32_35 : i32 to vector<1x128xi32>
    %140 = arith.cmpi slt, %57, %139 : vector<1x128xi32>
    %141 = arith.andi %138, %140 : vector<1x128xi1>
    %c16_i32_36 = arith.constant 16 : i32
    %142 = vector.broadcast %c16_i32_36 : i32 to vector<1x128xi32>
    %143 = arith.muli %57, %142 : vector<1x128xi32>
    %144 = arith.addi %143, %55 : vector<1x128xi32>
    %c-1_i32_37 = arith.constant -1 : i32
    %145 = vector.broadcast %c-1_i32_37 : i32 to vector<1x128xi32>
    %146 = arith.select %141, %144, %145 : vector<1x128xi1>, vector<1x128xi32>
    %147 = vector.broadcast %146 : vector<1x128xi32> to vector<256x128xi32>
    %148 = arith.cmpi eq, %58, %147 : vector<256x128xi32>
    %cst_38 = arith.constant 0.000000e+00 : f32
    %149 = vector.shape_cast %130 : vector<1x128xf32> to vector<1x128xf32>
    %150 = vector.broadcast %149 : vector<1x128xf32> to vector<256x128xf32>
    %151 = vector.broadcast %cst_38 : f32 to vector<256x128xf32>
    %152 = arith.select %148, %150, %151 : vector<256x128xi1>, vector<256x128xf32>
    %153 = arith.addf %129, %152 : vector<256x128xf32>
    %c0_39 = arith.constant 0 : index
    %c0_40 = arith.constant 0 : index
    %c0_41 = arith.constant 0 : index
    %154 = vector.load %arg4[%c0_39, %c0_40, %c0_41] : memref<1x4x256xf32, #tpu.memory_space<vmem>>, vector<1x4x256xf32>
    %155 = vector.shape_cast %154 : vector<1x4x256xf32> to vector<4x256xf32>
    %cst_42 = arith.constant dense<0.000000e+00> : vector<4x128xf32>
    %156 = tpu.matmul %155, %153, %cst_42 {dimension_numbers = #tpu.dot_dimension_numbers<[1], [0], [0], [1], [0, 0, 1, 1], [], []>} : vector<4x256xf32>, vector<256x128xf32>, vector<4x128xf32> -> vector<4x128xf32>
    %c0_43 = arith.constant 0 : index
    %c0_44 = arith.constant 0 : index
    %c0_45 = arith.constant 0 : index
    %157 = vector.load %arg5[%c0_43, %c0_44, %c0_45] : memref<1x4x128xf32, #tpu.memory_space<vmem>>, vector<1x4x128xf32>
    %158 = vector.shape_cast %157 : vector<1x4x128xf32> to vector<4x128xf32>
    %159 = vector.shape_cast %156 : vector<4x128xf32> to vector<1x4x128xf32>
    tpu.vector_store %arg5[%c0_43, %c0_44, %c0_45], %159 {strides = array<i32>} : memref<1x4x128xf32, #tpu.memory_space<vmem>>, vector<1x4x128xf32>,
    return
  }
  func.func @transform_0(%arg0: i32, %arg1: i32) -> (i32, i32) {
    %c0_i32 = arith.constant 0 : i32
    %c0_i32_0 = arith.constant 0 : i32
    %c0_i32_1 = arith.constant 0 : i32
    return %c0_i32, %c0_i32_0 : i32, i32
  }
  func.func @transform_1(%arg0: i32, %arg1: i32) -> (i32, i32) {
    %c0_i32 = arith.constant 0 : i32
    %c0_i32_0 = arith.constant 0 : i32
    return %c0_i32, %arg1 : i32, i32
  }
  func.func @transform_2(%arg0: i32, %arg1: i32) -> (i32, i32, i32) {
    %c0_i32 = arith.constant 0 : i32
    %c0_i32_0 = arith.constant 0 : i32
    %c0_i32_1 = arith.constant 0 : i32
    return %arg0, %c0_i32, %c0_i32_0 : i32, i32, i32
  }
  func.func @transform_3(%arg0: i32, %arg1: i32) -> (i32, i32, i32) {
    %c0_i32 = arith.constant 0 : i32
    %c0_i32_0 = arith.constant 0 : i32
    return %arg0, %c0_i32, %arg1 : i32, i32, i32
  }
}

module attributes {stable_mosaic.version = 11 : i64} {
  func.func @_unet_fused_kernel(%arg0: i32, %arg1: i32, %arg2: memref<1x36x256xbf16, #tpu.memory_space<vmem>>, %arg3: memref<16x36xbf16, #tpu.memory_space<vmem>>, %arg4: memref<16x1xf32, #tpu.memory_space<vmem>>, %arg5: memref<1x16xf32, #tpu.memory_space<vmem>>, %arg6: memref<1x1xf32, #tpu.memory_space<vmem>>, %arg7: memref<1x1x256xf32, #tpu.memory_space<vmem>>) attributes {dimension_semantics = [#tpu.dimension_semantics<parallel>, #tpu.dimension_semantics<parallel>], iteration_bounds = array<i64: 2, 1>, scalar_prefetch = 0 : i64, scratch_operands = 0 : i64, tpu.core_type = #tpu.core_type<tc>, window_params = [{transform_indices = @transform_0, window_bounds = array<i64: 1, 36, 256>}, {pipeline_mode = #tpu.pipeline_mode<synchronous>, transform_indices = @transform_1, window_bounds = array<i64: 16, 36>}, {pipeline_mode = #tpu.pipeline_mode<synchronous>, transform_indices = @transform_2, window_bounds = array<i64: 16, 1>}, {pipeline_mode = #tpu.pipeline_mode<synchronous>, transform_indices = @transform_3, window_bounds = array<i64: 1, 16>}, {pipeline_mode = #tpu.pipeline_mode<synchronous>, transform_indices = @transform_4, window_bounds = array<i64: 1, 1>}, {transform_indices = @transform_5, window_bounds = array<i64: 1, 1, 256>}]} {
    %c0 = arith.constant 0 : index
    %c0_0 = arith.constant 0 : index
    %0 = vector.load %arg3[%c0, %c0_0] : memref<16x36xbf16, #tpu.memory_space<vmem>>, vector<16x36xbf16>
    %c0_1 = arith.constant 0 : index
    %c0_2 = arith.constant 0 : index
    %c0_3 = arith.constant 0 : index
    %1 = vector.load %arg2[%c0_1, %c0_2, %c0_3] : memref<1x36x256xbf16, #tpu.memory_space<vmem>>, vector<1x36x256xbf16>
    %2 = vector.shape_cast %1 : vector<1x36x256xbf16> to vector<36x256xbf16>
    %cst = arith.constant dense<0.000000e+00> : vector<16x256xf32>
    %3 = tpu.matmul %0, %2, %cst {dimension_numbers = #tpu.dot_dimension_numbers<[1], [0], [0], [1], [0, 0, 1, 1], [], []>} : vector<16x36xbf16>, vector<36x256xbf16>, vector<16x256xf32> -> vector<16x256xf32>
    %c0_4 = arith.constant 0 : index
    %c0_5 = arith.constant 0 : index
    %4 = vector.load %arg4[%c0_4, %c0_5] : memref<16x1xf32, #tpu.memory_space<vmem>>, vector<16x1xf32>
    %5 = vector.broadcast %4 : vector<16x1xf32> to vector<16x256xf32>
    %6 = arith.addf %3, %5 : vector<16x256xf32>
    %cst_6 = arith.constant 0.000000e+00 : f32
    %7 = vector.broadcast %cst_6 : f32 to vector<16x256xf32>
    %8 = arith.maximumf %6, %7 : vector<16x256xf32>
    %c0_7 = arith.constant 0 : index
    %c0_8 = arith.constant 0 : index
    %9 = vector.load %arg5[%c0_7, %c0_8] : memref<1x16xf32, #tpu.memory_space<vmem>>, vector<1x16xf32>
    %cst_9 = arith.constant dense<0.000000e+00> : vector<1x256xf32>
    %10 = tpu.matmul %9, %8, %cst_9 {dimension_numbers = #tpu.dot_dimension_numbers<[1], [0], [0], [1], [0, 0, 1, 1], [], []>} : vector<1x16xf32>, vector<16x256xf32>, vector<1x256xf32> -> vector<1x256xf32>
    %c0_10 = arith.constant 0 : index
    %c0_11 = arith.constant 0 : index
    %11 = vector.load %arg6[%c0_10, %c0_11] : memref<1x1xf32, #tpu.memory_space<vmem>>, vector<1x1xf32>
    %12 = vector.broadcast %11 : vector<1x1xf32> to vector<1x256xf32>
    %13 = arith.addf %10, %12 : vector<1x256xf32>
    %14 = arith.negf %13 : vector<1x256xf32>
    %15 = math.exp %14 : vector<1x256xf32>
    %cst_12 = arith.constant 1.000000e+00 : f32
    %16 = vector.broadcast %cst_12 : f32 to vector<1x256xf32>
    %17 = arith.addf %16, %15 : vector<1x256xf32>
    %18 = arith.divf %16, %17 : vector<1x256xf32>
    %c0_13 = arith.constant 0 : index
    %c0_14 = arith.constant 0 : index
    %c0_15 = arith.constant 0 : index
    %19 = vector.load %arg7[%c0_13, %c0_14, %c0_15] : memref<1x1x256xf32, #tpu.memory_space<vmem>>, vector<1x1x256xf32>
    %20 = vector.shape_cast %19 : vector<1x1x256xf32> to vector<1x256xf32>
    %21 = vector.shape_cast %18 : vector<1x256xf32> to vector<1x1x256xf32>
    tpu.vector_store %arg7[%c0_13, %c0_14, %c0_15], %21 {strides = array<i32>} : memref<1x1x256xf32, #tpu.memory_space<vmem>>, vector<1x1x256xf32>,
    return
  }
  func.func @transform_0(%arg0: i32, %arg1: i32) -> (i32, i32, i32) {
    %c0_i32 = arith.constant 0 : i32
    %c0_i32_0 = arith.constant 0 : i32
    return %arg0, %c0_i32, %arg1 : i32, i32, i32
  }
  func.func @transform_1(%arg0: i32, %arg1: i32) -> (i32, i32) {
    %c0_i32 = arith.constant 0 : i32
    %c0_i32_0 = arith.constant 0 : i32
    %c0_i32_1 = arith.constant 0 : i32
    return %c0_i32, %c0_i32_0 : i32, i32
  }
  func.func @transform_2(%arg0: i32, %arg1: i32) -> (i32, i32) {
    %c0_i32 = arith.constant 0 : i32
    %c0_i32_0 = arith.constant 0 : i32
    %c0_i32_1 = arith.constant 0 : i32
    return %c0_i32, %c0_i32_0 : i32, i32
  }
  func.func @transform_3(%arg0: i32, %arg1: i32) -> (i32, i32) {
    %c0_i32 = arith.constant 0 : i32
    %c0_i32_0 = arith.constant 0 : i32
    %c0_i32_1 = arith.constant 0 : i32
    return %c0_i32, %c0_i32_0 : i32, i32
  }
  func.func @transform_4(%arg0: i32, %arg1: i32) -> (i32, i32) {
    %c0_i32 = arith.constant 0 : i32
    %c0_i32_0 = arith.constant 0 : i32
    %c0_i32_1 = arith.constant 0 : i32
    return %c0_i32, %c0_i32_0 : i32, i32
  }
  func.func @transform_5(%arg0: i32, %arg1: i32) -> (i32, i32, i32) {
    %c0_i32 = arith.constant 0 : i32
    %c0_i32_0 = arith.constant 0 : i32
    return %arg0, %c0_i32, %arg1 : i32, i32, i32
  }
}

</mosaic_0001>

<bundles_post_ra>
// kernel: tile.8
= control target key start
LH: loop header
LB: loop body
LE: loop exit
PB: predicated region body
PF: predicated region fallthrough
CT: control target
= control target key end

     0   :  { %s28_s0 = inlined_call_operand.vmem [shape: f32[16], index: 0, kind: input, shape index: {}]   ;;  %s29_s1 = inlined_call_operand.vmem [shape: f32[16,16], index: 1, kind: output, shape index: {}]  }
   0x1   :  { %v4_v0 = vld [vmem:[%s28_s0] ss:$0 sm:$0xff] }
   0x2   :  { %5 = vst [vmem:[%s29_s1] sm:$0xff] %v4_v0  ;;  %8 = vst [vmem:[%s29_s1 + $0x8] sm:$0xff] %v4_v0 }

// kernel: _lambda_.5
= control target key start
LH: loop header
LB: loop body
LE: loop exit
PB: predicated region body
PF: predicated region fallthrough
CT: control target
= control target key end

     0   :  { %vm29_vm0 = vcmask 64512   ;;  %v231_v0 = vmov 0.0   ;;  %vm232_vm1 = vmmov 0   ;;  %v233_v4 = vmov 0.0|0.0   ;;  %s291_s1 = inlined_call_operand.vmem [shape: f32[8,32], index: 1, kind: input, shape index: {}]   ;;  %s292_s0 = inlined_call_operand.vmem [shape: f32[2,8], index: 0, kind: input, shape index: {}]   ;;  %s293_s3 = inlined_call_operand.vmem [shape: f32[32,6], index: 3, kind: input, shape index: {}]   ;;  %s294_s2 = inlined_call_operand.vmem [shape: f32[1,32], index: 2, kind: input, shape index: {}]   ;;  %s295_s4 = inlined_call_operand.vmem [shape: f32[1,6], index: 4, kind: input, shape index: {}]   ;;  %s296_s5 = inlined_call_operand.vmem [shape: f32[2,6], index: 5, kind: output, shape index: {}]  }
   0x1   :  { %206 = vmatprep.subr.mxu0 %v231_v0  ;;  %v21_v1 = vld [vmem:[%s291_s1] sm:$0xff]  ;;  %208 = vmatprep.mubr.msk.f32.mxu0 %vm232_vm1, %v231_v0  ;;  %v105_v5 = vld [vmem:[%s293_s3 + $0x8] sm:$0xff]  ;;  %v106_v7 = vld [vmem:[%s293_s3 + $0x10] sm:$0xff]  ;;  %vm115_vm2 = vcmask 261120   ;;  %vm189_vm3 = vcmask 41984  }
   0x2   :  { %v20_v2 = vld [vmem:[%s292_s0] sm:$0x3]  ;;  %207 = vmatpush3.msra.mxu0 %v21_v1  ;;  %222 = vmatprep.subr.bf16.mxu1 %v233_v4  ;;  %v107_v8 = vld [vmem:[%s293_s3 + $0x18] sm:$0xff] }
   0x3   :  { %v104_v3 = vld [vmem:[%s293_s3] sm:$0xff]  ;;  %209 = vmatmul.mubr.msk.f32.vlgmr.msra.gmra.mrb[0].mxu0 %vm29_vm0, %v20_v2  ;;  %219 = vmatprep.mubr.msk.f32.mxu1 %vm232_vm1, %v231_v0  ;;  %v226_v9 = vpack.c.bf16 %v107_v8, %v106_v7 }
   0x4   :  { %v223_v6 = vpack.c.bf16 %v105_v5, %v104_v3  ;;  %v195_v10 = vld [vmem:[%s294_s2] ss:$0 sm:$0xff] }
   0x5   :  { %v197_v15 = vld [vmem:[%s295_s4] ss:$0 sm:$0xff] }
   0x6   :  { %224 = vmatpush3.bf16.msra.mxu1 %v223_v6 }
   0x7   :  { %225 = vmatprep.subr.bf16.mxu1 %v233_v4 }
   0xa   :  { %227 = vmatpush3.bf16.msra.mxu1 %v226_v9 }
  0xd6   :  { %v99_v11 = vpop.f32.mrb[0].mxu0 }
  0xd7   :  { %v100_v12 = vadd.f32 %v195_v10, %v99_v11  ;;  %v210_v13 = vpop.f32.mrb[1].mxu0 }
  0xd9   :  { %v103_v14 = vmax.f32 %v100_v12, 0.0 }
  0xdb   :  { %220 = vmatmul.mubr.msk.f32.vlgmr.msra.gmra.mrb[0].mxu1 %vm115_vm2, %v103_v14 }
 0x1ae   :  { %v185_v16 = vpop.f32.mrb[0].mxu1 }
 0x1af   :  { %v186_v17 = vadd.f32 %v197_v15, %v185_v16  ;;  %v221_v18 = vpop.f32.mrb[1].mxu1 }
 0x1b1   :  { %190 = vst.msk [vmem:[%s296_s5] sm:$0x3] %vm189_vm3, %v186_v17 }

// kernel: _lambda_.4
= control target key start
LH: loop header
LB: loop body
LE: loop exit
PB: predicated region body
PF: predicated region fallthrough
CT: control target
= control target key end

     0   :  { %s469_s12 = smov 0   ;;  %s471_s13 = smov 0   ;;  %s510_s0 = inlined_call_operand.vmem [shape: bf16[2,36,256], index: 0, kind: input, shape index: {}]   ;;  %s511_s1 = inlined_call_operand.vmem [shape: bf16[8,36], index: 1, kind: input, shape index: {}]   ;;  %s512_s2 = inlined_call_operand.vmem [shape: f32[8,1], index: 2, kind: input, shape index: {}]   ;;  %s513_s3 = inlined_call_operand.vmem [shape: f32[2,8,1], index: 3, kind: output, shape index: {}]  }
   0x1   :  { %s473_s14 = smov 0  }
   0x2 LB: > { %s25_s15 = sadd.s32 1, %s441_s13  ;;  %p374_p0 = scmp.ge.s32.totalorder %s445_s14, 1  ;;  %s445_s14 = sphi %s473_s14, %s13_s14   ;;  %s441_s13 = sphi %s471_s13, %s515_s13   ;;  %s437_s12 = sphi %s469_s12, %s514_s12  }
   0x3   : > { %p27_p1 = scmp.ge.s32.totalorder %s25_s15, 2  ;;  %p156_p2 = scmp.lt.s32.totalorder %s445_s14, 3 }
   0x5   : > { %s517_s15 = smov (%p27_p1, %s25_s15), 0  ;;  %p157_p3 = pnand %p374_p0, %p156_p2 }
   0x6   : > { %p184_p4 = scmp.lt.s32.totalorder (!%p157_p3), %s437_s12, 1  ;;  %v447_v0 = vmov (!%p157_p3), 0   ;;  %v210_v1 = vld [vmem:[%s512_s2] sm:$0xff] (!%p157_p3)  ;;  %vm245_vm0 = vcmask (!%p157_p3), 1041408   ;;  %vm241_vm1 = vcmask (!%p157_p3), 293888   ;;  %vm202_vm2 = vcmask (!%p157_p3), 7168  }
   0x7   : > { %160 = sbr.rel (%p157_p3) target bundleno = 397 (0x18d), region = 32  ;;  %284 = vmatprep.mubr.bf16.mxu0 (!%p157_p3), %v447_v0  ;;  %414 = vset.pattern.permute.xlu0 (!%p157_p3), %v447_v0  ;;  %v204_v10 = vld [vmem:[%s511_s1] sm:$0xf] (!%p157_p3)  ;;  %v448_v11 = vmov (!%p157_p3), 0.0  }
   0x8   : > { %213 = vperm.xlu0 (!%p157_p3), %414, %v210_v1  }
   0xe   : > { %s519_s12 = smov (!%p184_p4, %s437_s12), 1 }
   0xf   : > { %s387_s18 = smul.u32 40, %s519_s12  ;;  %s376_s24 = sshll.u32 %s519_s12, 3 }
  0x10   : > { %s196_s27 = scalar_lea.vmem %s513_s3, %s376_s24 }
  0x11   : > { %s191_s21 = scalar_lea.vmem %s510_s0, %s387_s18  ;;  %203 = vst.msk [vmem:[%s196_s27] sm:$0xff] %vm202_vm2, %v448_v11 }
  0x12   : > { %v415_v2 = vld [vmem:[%s191_s21 + $0x4] ss:$8 sps:$4 sm:$0xff]   ;;  %v417_v3 = vld [vmem:[%s191_s21] ss:$8 sps:$4 sm:$0xff]   ;;  %v418_v4 = vld [vmem:[%s191_s21 + $0x14] ss:$8 sps:$4 sm:$0xff]  }
  0x13   : > { %252 = vmatprep.subr.bf16.mxu0 %v415_v2  ;;  %v209_v5 = vld [vmem:[%s191_s21 + $0x20] sm:$0x33]  ;;  %v420_v6 = vld [vmem:[%s191_s21 + $0x10] ss:$8 sps:$4 sm:$0xff]  }
  0x14   : > { %253 = vmatpush1.bf16.msra.mxu0 %v417_v3  ;;  %v382_v7 = vcombine.high %v209_v5, %v209_v5  ;;  %v381_v8 = vcombine.low %v209_v5, %v209_v5 }
  0x15   : > { %254 = vmatprep.subr.bf16.mxu0 %v418_v4 }
  0x16   : > { %v247_v9 = vsel %vm245_vm0, %v381_v8, 0 }
  0x18   : > { %255 = vmatpush1.bf16.msra.mxu0 %v420_v6  ;;  %v295_v22 = vld [vmem:[%s196_s27] sm:$0xff] }
  0x19   : > { %383 = vmatprep.subr.msk.bf16.mxu0 %vm245_vm0, %v382_v7 }
  0x1c   : > { %257 = vmatpush1.bf16.msra.mxu0 %v247_v9 }
  0x1f   : > { %384 = vmatmul.mubr.msk.bf16.vlgmr.msra.gmra.mrb[0].mxu0 %vm241_vm1, %v204_v10 }
  0x87   : > { %v214_v12 = vpop.permute.xlu0 %213 }
  0xf2   : > { %v286_v13 = vpop.f32.mrb[0].mxu0 }
  0xf3   : > { %v287_v14 = vadd.f32 %v286_v13, %v214_v12  ;;  %v288_v15 = vpop.f32.mrb[1].mxu0 }
  0xf4   : > { %v289_v16 = vadd.f32 %v288_v15, %v214_v12  ;;  %v290_v17 = vpop.f32.mrb[2].mxu0 }
  0xf5   : > { %v293_v18 = vmax.f32 %v287_v14, 0.0  ;;  %v291_v19 = vpop.f32.mrb[3].mxu0 }
  0xf6   : > { %v294_v20 = vmax.f32 %v289_v16, 0.0 }
  0xf8   : > { %v296_v21 = vadd.f32 %v294_v20, %v293_v18 }
  0xfa   : > { %297 = vadd.xlane.f32.xlu0 %v296_v21 }
 0x187   : > { %v298_v23 = vpop.xlane.xlu0 %297 }
 0x188   : > { %v299_v24 = vmul.f32 0.00390625, %v298_v23 }
 0x18a   : > { %v300_v25 = vadd.f32 %v299_v24, %v295_v22 }
 0x18c   : > { %302 = vst.msk [vmem:[%s196_s27] sm:$0xff] %vm202_vm2, %v300_v25 }
 0x18d PF: > { %s13_s14 = sadd.s32 1, %s445_s14   ;;  %s514_s12 = smov %s441_s13 }
 0x18e   : > { %p10_p5 = scmp.ge.s32.totalorder %s13_s14, 4   ;;  %s515_s13 = smov %s517_s15 }
 0x190   :  { %12 = sbr.rel (!%p10_p5) target bundleno = 2 (0x2), region = 66 }

// kernel: _lambda_.6
= control target key start
LH: loop header
LB: loop body
LE: loop exit
PB: predicated region body
PF: predicated region fallthrough
CT: control target
= control target key end

     0   :  { %8 = vsyncpa [#allocation3], 0  ;;  %s1118_s12 = smov 0   ;;  %s1120_s13 = smov 0   ;;  %s1758_s0 = inlined_call_operand.vmem [shape: f32[2,6], index: 0, kind: input, shape index: {}]   ;;  %s1759_s1 = inlined_call_operand.vmem [shape: f32[2,256], index: 1, kind: input, shape index: {}]   ;;  %s1760_s2 = inlined_call_operand.vmem [shape: f32[2,4,256], index: 2, kind: input, shape index: {}]   ;;  %s1761_s3 = inlined_call_operand.vmem [shape: f32[2,4,256], index: 3, kind: output, shape index: {}]  }
   0x1   :  { %s1122_s14 = smov 0   ;;  %s1124_s15 = smov 0  }
   0x2   :  { %s1126_s16 = smov 0  }
   0x3 LB: > { %s897_s17 = sadd.s32 4294967295, %s1095_s16   ;;  %s23_s18 = sadd.s32 1, %s1087_s14  ;;  %s1095_s16 = sphi %s1126_s16, %s14_s16   ;;  %s1091_s15 = sphi %s1124_s15, %s1775_s15   ;;  %s1087_s14 = sphi %s1122_s14, %s1774_s14   ;;  %s1083_s13 = sphi %s1120_s13, %s1773_s13   ;;  %s1079_s12 = sphi %s1118_s12, %s1772_s12  }
   0x4   : > { %p24_p0 = scmp.ge.s32.totalorder %s23_s18, 2  ;;  %s26_s19 = sadd.s32 1, %s1091_s15 }
   0x5   : > { %p899_p1 = scmp.ge.s32.totalorder %s1095_s16, 1  ;;  %p132_p2 = scmp.lt.s32.totalorder %s1095_s16, 5 }
   0x6   : > { %s1777_s18 = smov (%p24_p0, %s23_s18), 0  ;;  %s1779_s19 = smov (!%p24_p0, %s26_s19), %s1091_s15 }
   0x7   : > { %p1151_p3 = pnand %p899_p1, %p132_p2  ;;  %p28_p4 = scmp.ge.s32.totalorder %s1779_s19, 2 }
   0x8   : > { %p1155_p5 = scmp.eq.s32.totalorder %s897_s17, 0  ;;  %s145_s24 = sshll.u32 %s1758_s0, 4  ;;  %s146_s24 = int_to_ptr.vmem [resolvable:$true] %s145_s24 }
   0x9   : > { %p990_p6 = pneg %p1151_p3  ;;  %s1781_s19 = smov (%p28_p4, %s1779_s19), 0 }
   0xa   : > { %s1038_s25 = scalar_lea.vmem %s146_s24, 32  ;;  %p1046_p12 = scmp.lt.s32.totalorder %s146_s24, %s146_s24 }
   0xb   : > { %p991_p7 = pnand %p1155_p5, %p990_p6  ;;  %p1039_p8 = scmp.ne.s32.totalorder %s146_s24, %s1038_s25 }
   0xc   : > { %p1047_p13 = scmp.lt.s32.totalorder %s1038_s25, %s1038_s25 }
   0xd   : > { %p1040_p9 = pneg %p991_p7 }
   0xe   : > { %p1048_p0 = por %p1047_p13, %p1046_p12 }
   0xf   : > { %p1041_p10 = pnand %p1040_p9, %p1039_p8 }
  0x11   : > { %p1042_p11 = pneg %p1041_p10 }
  0x13   : > { %p1049_p1 = pnand %p1048_p0, %p1042_p11 }
  0x15   : > { %1052 = shalt.err (!%p1049_p1)
}
  0x16   : > { %s1097_s26 = smov [#allocation2]   ;;  %173 = sbr.rel (%p1151_p3) target bundleno = 390 (0x186), region = 32 }
  0x17   : > { %993 = dma.vmem_to_smem (!%p991_p7), %s146_s24, 32, %s1097_s26, [#allocation3]  }
  0x1d   : > { %1074 = dma.done.wait (%p1155_p5), [#allocation3], 32  }
  0x1e   : > { %1076 = vsyncadd (%p1155_p5), [#allocation3], 4294967264 }
  0x1f   : > { %179 = sfence }
  0x20   : > { %p205_p2 = scmp.lt.s32.totalorder %s1079_s12, 1  ;;  %s909_s27 = sshll.u32 %s1083_s13, 7  ;;  %v268_v17 = vlaneseq }
  0x21   : > { %s223_s28 = sld [smem:[#allocation2 + %s909_s27]]  ;;  %s224_s29 = sadd.s32 1, %s909_s27 }
  0x22   : > { %s1783_s12 = smov (!%p205_p2, %s1079_s12), 1  ;;  %s225_s30 = sld [smem:[#allocation2 + %s224_s29]]  ;;  %v1195_v23 = vshrl.u32 %v268_v17, 7 }
  0x23   : > { %s226_s4 = sadd.s32 2, %s909_s27  ;;  %s904_s5 = sshll.u32 %s1783_s12, 1 }
  0x24   : > { %s227_s6 = sld [smem:[#allocation2 + %s226_s4]]  ;;  %s208_s9 = scalar_lea.vmem %s1759_s1, %s904_s5  ;;  %v1198_v26 = vadd.s32 128, %v1195_v23  ;;  %v1201_v29 = vadd.s32 136, %v1195_v23  ;;  %v1204_v30 = vsub.s32 0, %v1195_v23  ;;  %v1207_v31 = vadd.s32 8, %v1195_v23 }
  0x25   : > { %s228_s10 = sadd.s32 3, %s909_s27  ;;  %s230_s17 = sadd.s32 4, %s909_s27  ;;  %v234_v0 = vld [vmem:[%s208_s9] sm:$0x1]  ;;  %v235_v1 = vld [vmem:[%s208_s9 + $0x1] sm:$0x1] }
  0x26   : > { %s229_s11 = sld [smem:[#allocation2 + %s228_s10]]  ;;  %s232_s21 = sadd.s32 5, %s909_s27  ;;  %v1210_v32 = vadd.s32 144, %v1195_v23  ;;  %v1213_v33 = vadd.s32 152, %v1195_v23  ;;  %v1216_v34 = vadd.s32 16, %v1195_v23  ;;  %v1219_v37 = vadd.s32 24, %v1195_v23 }
  0x27   : > { %s231_s20 = sld [smem:[#allocation2 + %s230_s17]]  ;;  %v236_v2 = vstv %s223_s28  ;;  %p209_p3 = scmp.lt.s32.totalorder %s1083_s13, 1  ;;  %v1222_v38 = vadd.s32 160, %v1195_v23  ;;  %v1225_v40 = vadd.s32 168, %v1195_v23  ;;  %v1228_v41 = vadd.s32 32, %v1195_v23 }
  0x28   : > { %s233_s22 = sld [smem:[#allocation2 + %s232_s21]]  ;;  %v237_v3 = vmul.f32 %v236_v2, %v234_v0  ;;  %v238_v4 = vstv %s225_s30  ;;  %v1231_v42 = vadd.s32 40, %v1195_v23  ;;  %v1234_v45 = vadd.s32 176, %v1195_v23 }
  0x29   : > { %v239_v5 = vmul.f32 %v238_v4, %v235_v1  ;;  %s1785_s13 = smov (!%p209_p3, %s1083_s13), 1  ;;  %v1237_v46 = vadd.s32 184, %v1195_v23  ;;  %v1240_v47 = vadd.s32 48, %v1195_v23  ;;  %v1243_v48 = vadd.s32 56, %v1195_v23 }
  0x2a   : > { %v241_v6 = vstv %s227_s6  ;;  %s914_s23 = sshll.u32 %s1785_s13, 3  ;;  %v1246_v49 = vadd.s32 192, %v1195_v23  ;;  %v1249_v50 = vadd.s32 200, %v1195_v23  ;;  %v1252_v55 = vadd.s32 64, %v1195_v23  ;;  %s907_s27 = sshll.u32 %s1785_s13, 1 }
  0x2b   : > { %v240_v7 = vadd.f32 %v239_v5, %v237_v3  ;;  %s213_s26 = scalar_lea.vmem %s1760_s2, %s914_s23  ;;  %v1255_v56 = vadd.s32 72, %v1195_v23  ;;  %v1262_v60 = vadd.s32 208, %v1195_v23  ;;  %v1265_v61 = vadd.s32 216, %v1195_v23  ;;  %s219_s28 = sadd.s32 %s907_s27, %s1783_s12 }
  0x2c   : > { %v243_v8 = vstv %s229_s11  ;;  %v1191_v13 = vld [vmem:[%s213_s26] sm:$0xff]  ;;  %v1268_v62 = vadd.s32 80, %v1195_v23  ;;  %v1271_v63 = vadd.s32 88, %v1195_v23  ;;  %v1278_v2 = vadd.s32 224, %v1195_v23  ;;  %s908_s29 = sshll.u32 %s219_s28, 2 }
  0x2d   : > { %v244_v9 = vmul.f32 %v243_v8, %v234_v0  ;;  %v245_v10 = vstv %s231_s20  ;;  %v242_v11 = vadd.f32 %v241_v6, %v240_v7  ;;  %v719_v18 = vcombine.high %v1191_v13, %v1191_v13  ;;  %s221_s5 = scalar_lea.vmem %s1761_s3, %s908_s29 }
  0x2e   : > { %v246_v12 = vmul.f32 %v245_v10, %v235_v1  ;;  %v248_v14 = vstv %s233_s22  ;;  %v1284_v6 = vadd.s32 232, %v1195_v23  ;;  %v1292_v10 = vadd.s32 96, %v1195_v23 }
  0x2f   : > { %v250_v16 = vadd.f32 1.0, %v242_v11  ;;  %785 = vmatprep.mubr.f32.mxu0 %v719_v18  ;;  %v1302_v17 = vadd.s32 240, %v1195_v23  ;;  %v1305_v18 = vadd.s32 248, %v1195_v23 }
  0x30   : > { %v247_v15 = vadd.f32 %v246_v12, %v244_v9 }
  0x31   : > { %v251_v20 = vmul.f32 16.0, %v250_v16  ;;  %v1299_v16 = vadd.s32 104, %v1195_v23 }
  0x32   : > { %v249_v19 = vadd.f32 %v248_v14, %v247_v15 }
  0x33   : > { %v910_v21 = vadd.f32 -1.0, %v251_v20 }
  0x34   : > { %v254_v22 = vadd.f32 1.0, %v249_v19 }
  0x35   : > { %v253_v24 = vmul.f32 0.5, %v910_v21 }
  0x36   : > { %v255_v25 = vmul.f32 16.0, %v254_v22 }
  0x37   : > { %v258_v28 = vfloor.f32 %v253_v24 }
  0x38   : > { %v911_v27 = vadd.f32 -1.0, %v255_v25 }
  0x39   : > { %v982_v36 = vtrunc.f32 %v258_v28  ;;  %v260_v39 = vsub.f32 %v253_v24, %v258_v28 }
  0x3a   : > { %v257_v35 = vmul.f32 0.5, %v911_v27 }
  0x3b   : > { %v983_v44 = vcvt.f32.s32 %v982_v36  ;;  %v261_v54 = vsub.f32 1.0, %v260_v39 }
  0x3c   : > { %v259_v43 = vfloor.f32 %v257_v35 }
  0x3d   : > { %v266_v53 = vadd.s32 1, %v983_v44  ;;  %vm302_vm0 = vcmp.ge.s32.totalorder %v983_v44, 0  ;;  %vm303_vm1 = vcmp.lt.s32.totalorder %v983_v44, 16 }
  0x3e   : > { %v262_v51 = vsub.f32 %v257_v35, %v259_v43  ;;  %v984_v52 = vtrunc.f32 %v259_v43  ;;  %vm1257_vm2 = vmand %vm302_vm0, %vm303_vm1  ;;  %v1330_v35 = vadd.s32 112, %v1195_v23 }
  0x3f   : > { %vm385_vm3 = vcmp.ge.s32.totalorder %v266_v53, 0  ;;  %vm386_vm4 = vcmp.lt.s32.totalorder %v266_v53, 16 }
  0x40   : > { %v263_v57 = vsub.f32 1.0, %v262_v51  ;;  %v985_v58 = vcvt.f32.s32 %v984_v52  ;;  %vm1273_vm7 = vmand %vm385_vm3, %vm386_vm4  ;;  %v496_v8 = vmul.f32 %v262_v51, %v261_v54  ;;  %v608_v14 = vmul.f32 %v262_v51, %v260_v39 }
  0x42   : > { %v267_v0 = vadd.s32 1, %v985_v58  ;;  %vm305_vm5 = vcmp.ge.s32.totalorder %v985_v58, 0  ;;  %vm307_vm6 = vcmp.lt.s32.totalorder %v985_v58, 16  ;;  %v301_v3 = vmul.f32 %v263_v57, %v261_v54 }
  0x43   : > { %vm306_vm8 = vmand %vm1257_vm2, %vm305_vm5  ;;  %v309_v4 = vmul.u32 16, %v985_v58  ;;  %v384_v5 = vmul.f32 %v263_v57, %v260_v39  ;;  %v1335_v39 = vrot.slane %v496_v8, %v1204_v30  ;;  %v1341_v43 = vrot.slane %v608_v14, %v1204_v30 }
  0x44   : > { %vm1287_vm9 = vmand %vm306_vm8, %vm307_vm6  ;;  %vm497_vm10 = vcmp.ge.s32.totalorder %v267_v0, 0  ;;  %v501_v9 = vmul.u32 16, %v267_v0  ;;  %vm499_vm12 = vcmp.lt.s32.totalorder %v267_v0, 16  ;;  %v1310_v20 = vrot.slane %v301_v3, %v1204_v30 }
  0x45   : > { %v310_v11 = vadd.s32 %v983_v44, %v309_v4  ;;  %vm388_vm11 = vmand %vm1273_vm7, %vm305_vm5  ;;  %v390_v12 = vadd.s32 %v309_v4, %v266_v53  ;;  %v1313_v22 = vrot.slane %v384_v5, %v1204_v30 }
  0x46   : > { %vm389_vm13 = vmand %vm388_vm11, %vm307_vm6  ;;  %v502_v15 = vadd.s32 %v983_v44, %v501_v9  ;;  %v611_v28 = vadd.s32 %v501_v9, %v266_v53  ;;  %v1344_v44 = vadd.s32 120, %v1195_v23 }
  0x47   : > { %v311_v19 = vsel %vm1287_vm9, %v310_v11, 4294967295  ;;  %v391_v21 = vsel %vm389_vm13, %v390_v12, 4294967295  ;;  %vm498_vm14 = vmand %vm1257_vm2, %vm497_vm10 }
  0x48   : > { %v1319_v24 = vrot.slane %v311_v19, %v1204_v30  ;;  %v1322_v25 = vrot.slane %v391_v21, %v1204_v30  ;;  %vm1325_vm15 = vmand %vm498_vm14, %vm499_vm12 }
  0x49   : > { %v503_v36 = vsel %vm1325_vm15, %v502_v15, 4294967295  ;;  %vm609_vm0 = vmand %vm1273_vm7, %vm497_vm10 }
  0x4a   : > { %vm332_vm1 = vcmp.eq.s32.totalorder %v1198_v26, %v1319_v24  ;;  %vm333_vm2 = vcmp.eq.s32.totalorder %v1201_v29, %v1319_v24  ;;  %vm412_vm3 = vcmp.eq.s32.totalorder %v1198_v26, %v1322_v25  ;;  %vm413_vm4 = vcmp.eq.s32.totalorder %v1201_v29, %v1322_v25  ;;  %vm610_vm5 = vmand %vm609_vm0, %vm499_vm12 }
  0x4b   : > { %v368_v51 = vsel %vm332_vm1, %v1310_v20, 0.0  ;;  %v369_v52 = vsel %vm333_vm2, %v1310_v20, 0.0  ;;  %v448_v53 = vsel %vm412_vm3, %v1313_v22, 0.0  ;;  %v449_v54 = vsel %vm413_vm4, %v1313_v22, 0.0 }
  0x4c   : > { %v480_v57 = vadd.f32 %v448_v53, %v368_v51  ;;  %v481_v58 = vadd.f32 %v449_v54, %v369_v52  ;;  %v1360_v59 = vrot.slane %v503_v36, %v1204_v30  ;;  %v612_v1 = vsel %vm610_vm5, %v611_v28, 4294967295 }
  0x4d   : > { %v1363_v3 = vrot.slane %v612_v1, %v1204_v30  ;;  %vm316_vm6 = vcmp.eq.s32.totalorder %v1195_v23, %v1319_v24  ;;  %vm317_vm7 = vcmp.eq.s32.totalorder %v1207_v31, %v1319_v24  ;;  %vm396_vm8 = vcmp.eq.s32.totalorder %v1195_v23, %v1322_v25 }
  0x4e   : > { %vm524_vm9 = vcmp.eq.s32.totalorder %v1198_v26, %v1360_v59  ;;  %vm525_vm10 = vcmp.eq.s32.totalorder %v1201_v29, %v1360_v59  ;;  %v352_v0 = vsel %vm316_vm6, %v1310_v20, 0.0  ;;  %v353_v30 = vsel %vm317_vm7, %v1310_v20, 0.0 }
  0x4f   : > { %v560_v4 = vsel %vm524_vm9, %v1335_v39, 0.0  ;;  %v561_v5 = vsel %vm525_vm10, %v1335_v39, 0.0  ;;  %vm633_vm11 = vcmp.eq.s32.totalorder %v1198_v26, %v1363_v3  ;;  %vm634_vm12 = vcmp.eq.s32.totalorder %v1201_v29, %v1363_v3 }
  0x50   : > { %v592_v7 = vadd.f32 %v560_v4, %v480_v57  ;;  %v593_v8 = vadd.f32 %v561_v5, %v481_v58  ;;  %v669_v9 = vsel %vm633_vm11, %v1341_v43, 0.0  ;;  %v670_v11 = vsel %vm634_vm12, %v1341_v43, 0.0 }
  0x51   : > { %vm397_vm13 = vcmp.eq.s32.totalorder %v1207_v31, %v1322_v25  ;;  %v432_v12 = vsel %vm396_vm8, %v1313_v22, 0.0  ;;  %vm508_vm14 = vcmp.eq.s32.totalorder %v1195_v23, %v1360_v59  ;;  %vm509_vm15 = vcmp.eq.s32.totalorder %v1207_v31, %v1360_v59 }
  0x52   : > { %v701_v26 = vadd.f32 %v669_v9, %v592_v7  ;;  %v702_v14 = vadd.f32 %v670_v11, %v593_v8  ;;  %v433_v29 = vsel %vm397_vm13, %v1313_v22, 0.0  ;;  %v464_v15 = vadd.f32 %v432_v12, %v352_v0 }
  0x53   : > { %v465_v19 = vadd.f32 %v433_v29, %v353_v30  ;;  %v544_v21 = vsel %vm508_vm14, %v1335_v39, 0.0  ;;  %v545_v27 = vsel %vm509_vm15, %v1335_v39, 0.0  ;;  %vm617_vm0 = vcmp.eq.s32.totalorder %v1195_v23, %v1363_v3 }
  0x54   : > { %v950_v28 = vpack.c.bf16 %v702_v14, %v701_v26  ;;  %v576_v36 = vadd.f32 %v544_v21, %v464_v15  ;;  %vm618_vm1 = vcmp.eq.s32.totalorder %v1207_v31, %v1363_v3  ;;  %v653_v51 = vsel %vm617_vm0, %v1341_v43, 0.0 }
  0x55   : > { %v577_v52 = vadd.f32 %v545_v27, %v465_v19  ;;  %v654_v53 = vsel %vm618_vm1, %v1341_v43, 0.0  ;;  %vm334_vm2 = vcmp.eq.s32.totalorder %v1210_v32, %v1319_v24  ;;  %vm335_vm3 = vcmp.eq.s32.totalorder %v1213_v33, %v1319_v24 }
  0x56   : > { %951 = vmatprep.subr.bf16.mxu0 %v950_v28  ;;  %v685_v54 = vadd.f32 %v653_v51, %v576_v36  ;;  %v370_v23 = vsel %vm334_vm2, %v1310_v20, 0.0  ;;  %v371_v57 = vsel %vm335_vm3, %v1310_v20, 0.0  ;;  %vm414_vm4 = vcmp.eq.s32.totalorder %v1210_v32, %v1322_v25 }
  0x57   : > { %v686_v31 = vadd.f32 %v654_v53, %v577_v52  ;;  %vm415_vm5 = vcmp.eq.s32.totalorder %v1213_v33, %v1322_v25  ;;  %v450_v58 = vsel %vm414_vm4, %v1313_v22, 0.0  ;;  %vm526_vm6 = vcmp.eq.s32.totalorder %v1210_v32, %v1360_v59 }
  0x58   : > { %v451_v1 = vsel %vm415_vm5, %v1313_v22, 0.0  ;;  %v482_v0 = vadd.f32 %v450_v58, %v370_v23  ;;  %vm527_vm7 = vcmp.eq.s32.totalorder %v1213_v33, %v1360_v59  ;;  %v562_v30 = vsel %vm526_vm6, %v1335_v39, 0.0 }
  0x59   : > { %v952_v4 = vpack.c.bf16 %v686_v31, %v685_v54  ;;  %v483_v5 = vadd.f32 %v451_v1, %v371_v57  ;;  %v563_v7 = vsel %vm527_vm7, %v1335_v39, 0.0  ;;  %vm635_vm8 = vcmp.eq.s32.totalorder %v1210_v32, %v1363_v3 }
  0x5a   : > { %v594_v8 = vadd.f32 %v562_v30, %v482_v0  ;;  %vm636_vm9 = vcmp.eq.s32.totalorder %v1213_v33, %v1363_v3  ;;  %v671_v9 = vsel %vm635_vm8, %v1341_v43, 0.0  ;;  %vm318_vm10 = vcmp.eq.s32.totalorder %v1216_v34, %v1319_v24 }
  0x5b   : > { %953 = vmatpush3.bf16.msra.mxu0 %v952_v4  ;;  %v595_v11 = vadd.f32 %v563_v7, %v483_v5  ;;  %v672_v12 = vsel %vm636_vm9, %v1341_v43, 0.0  ;;  %vm319_vm11 = vcmp.eq.s32.totalorder %v1219_v37, %v1319_v24  ;;  %v354_v26 = vsel %vm318_vm10, %v1310_v20, 0.0 }
  0x5c   : > { %v703_v14 = vadd.f32 %v671_v9, %v594_v8  ;;  %v355_v32 = vsel %vm319_vm11, %v1310_v20, 0.0  ;;  %vm398_vm12 = vcmp.eq.s32.totalorder %v1216_v34, %v1322_v25  ;;  %vm399_vm13 = vcmp.eq.s32.totalorder %v1219_v37, %v1322_v25 }
  0x5d   : > { %v704_v33 = vadd.f32 %v672_v12, %v595_v11  ;;  %v434_v29 = vsel %vm398_vm12, %v1313_v22, 0.0  ;;  %v435_v15 = vsel %vm399_vm13, %v1313_v22, 0.0  ;;  %vm510_vm14 = vcmp.eq.s32.totalorder %v1216_v34, %v1360_v59 }
  0x5e   : > { %v466_v19 = vadd.f32 %v434_v29, %v354_v26  ;;  %v467_v21 = vadd.f32 %v435_v15, %v355_v32  ;;  %vm511_vm15 = vcmp.eq.s32.totalorder %v1219_v37, %v1360_v59  ;;  %v546_v27 = vsel %vm510_vm14, %v1335_v39, 0.0 }
  0x5f   : > { %v954_v28 = vpack.c.bf16 %v704_v33, %v703_v14  ;;  %v547_v36 = vsel %vm511_vm15, %v1335_v39, 0.0  ;;  %vm619_vm0 = vcmp.eq.s32.totalorder %v1216_v34, %v1363_v3  ;;  %vm620_vm1 = vcmp.eq.s32.totalorder %v1219_v37, %v1363_v3 }
  0x60   : > { %v578_v51 = vadd.f32 %v546_v27, %v466_v19  ;;  %v579_v52 = vadd.f32 %v547_v36, %v467_v21  ;;  %v655_v53 = vsel %vm619_vm0, %v1341_v43, 0.0  ;;  %v656_v54 = vsel %vm620_vm1, %v1341_v43, 0.0 }
  0x61   : > { %955 = vmatprep.subr.bf16.mxu0 %v954_v28  ;;  %vm336_vm2 = vcmp.eq.s32.totalorder %v1222_v38, %v1319_v24  ;;  %vm337_vm3 = vcmp.eq.s32.totalorder %v1225_v40, %v1319_v24  ;;  %vm416_vm4 = vcmp.eq.s32.totalorder %v1222_v38, %v1322_v25  ;;  %vm417_vm5 = vcmp.eq.s32.totalorder %v1225_v40, %v1322_v25 }
  0x62   : > { %v687_v34 = vadd.f32 %v655_v53, %v578_v51  ;;  %v688_v37 = vadd.f32 %v656_v54, %v579_v52  ;;  %v372_v23 = vsel %vm336_vm2, %v1310_v20, 0.0  ;;  %v373_v57 = vsel %vm337_vm3, %v1310_v20, 0.0 }
  0x63   : > { %v452_v31 = vsel %vm416_vm4, %v1313_v22, 0.0  ;;  %v453_v58 = vsel %vm417_vm5, %v1313_v22, 0.0  ;;  %vm528_vm6 = vcmp.eq.s32.totalorder %v1222_v38, %v1360_v59  ;;  %vm529_vm7 = vcmp.eq.s32.totalorder %v1225_v40, %v1360_v59 }
  0x64   : > { %v956_v1 = vpack.c.bf16 %v688_v37, %v687_v34  ;;  %v484_v0 = vadd.f32 %v452_v31, %v372_v23  ;;  %v485_v30 = vadd.f32 %v453_v58, %v373_v57  ;;  %v564_v4 = vsel %vm528_vm6, %v1335_v39, 0.0 }
  0x65   : > { %v565_v5 = vsel %vm529_vm7, %v1335_v39, 0.0  ;;  %vm637_vm8 = vcmp.eq.s32.totalorder %v1222_v38, %v1363_v3  ;;  %vm638_vm9 = vcmp.eq.s32.totalorder %v1225_v40, %v1363_v3  ;;  %vm320_vm10 = vcmp.eq.s32.totalorder %v1228_v41, %v1319_v24 }
  0x66   : > { %957 = vmatpush3.bf16.msra.mxu0 %v956_v1  ;;  %v596_v7 = vadd.f32 %v564_v4, %v484_v0  ;;  %v597_v8 = vadd.f32 %v565_v5, %v485_v30  ;;  %v673_v9 = vsel %vm637_vm8, %v1341_v43, 0.0  ;;  %v674_v11 = vsel %vm638_vm9, %v1341_v43, 0.0 }
  0x67   : > { %vm321_vm11 = vcmp.eq.s32.totalorder %v1231_v42, %v1319_v24  ;;  %v356_v12 = vsel %vm320_vm10, %v1310_v20, 0.0  ;;  %vm400_vm12 = vcmp.eq.s32.totalorder %v1228_v41, %v1322_v25  ;;  %vm401_vm13 = vcmp.eq.s32.totalorder %v1231_v42, %v1322_v25 }
  0x68   : > { %v705_v38 = vadd.f32 %v673_v9, %v596_v7  ;;  %v706_v40 = vadd.f32 %v674_v11, %v597_v8  ;;  %v357_v26 = vsel %vm321_vm11, %v1310_v20, 0.0  ;;  %v436_v14 = vsel %vm400_vm12, %v1313_v22, 0.0 }
  0x69   : > { %v437_v32 = vsel %vm401_vm13, %v1313_v22, 0.0  ;;  %v468_v33 = vadd.f32 %v436_v14, %v356_v12  ;;  %vm512_vm14 = vcmp.eq.s32.totalorder %v1228_v41, %v1360_v59  ;;  %vm513_vm15 = vcmp.eq.s32.totalorder %v1231_v42, %v1360_v59 }
  0x6a   : > { %v958_v29 = vpack.c.bf16 %v706_v40, %v705_v38  ;;  %v469_v15 = vadd.f32 %v437_v32, %v357_v26  ;;  %v548_v19 = vsel %vm512_vm14, %v1335_v39, 0.0  ;;  %v549_v21 = vsel %vm513_vm15, %v1335_v39, 0.0 }
  0x6b   : > { %v580_v27 = vadd.f32 %v548_v19, %v468_v33  ;;  %vm621_vm0 = vcmp.eq.s32.totalorder %v1228_v41, %v1363_v3  ;;  %vm622_vm1 = vcmp.eq.s32.totalorder %v1231_v42, %v1363_v3  ;;  %vm338_vm2 = vcmp.eq.s32.totalorder %v1234_v45, %v1319_v24 }
  0x6c   : > { %959 = vmatprep.subr.bf16.mxu0 %v958_v29  ;;  %v581_v28 = vadd.f32 %v549_v21, %v469_v15  ;;  %v657_v36 = vsel %vm621_vm0, %v1341_v43, 0.0  ;;  %v658_v51 = vsel %vm622_vm1, %v1341_v43, 0.0  ;;  %vm339_vm3 = vcmp.eq.s32.totalorder %v1237_v46, %v1319_v24 }
  0x6d   : > { %v689_v52 = vadd.f32 %v657_v36, %v580_v27  ;;  %v374_v53 = vsel %vm338_vm2, %v1310_v20, 0.0  ;;  %v375_v41 = vsel %vm339_vm3, %v1310_v20, 0.0  ;;  %vm418_vm4 = vcmp.eq.s32.totalorder %v1234_v45, %v1322_v25 }
  0x6e   : > { %v690_v42 = vadd.f32 %v658_v51, %v581_v28  ;;  %vm419_vm5 = vcmp.eq.s32.totalorder %v1237_v46, %v1322_v25  ;;  %v454_v54 = vsel %vm418_vm4, %v1313_v22, 0.0  ;;  %vm530_vm6 = vcmp.eq.s32.totalorder %v1234_v45, %v1360_v59 }
  0x6f   : > { %v455_v34 = vsel %vm419_vm5, %v1313_v22, 0.0  ;;  %v486_v37 = vadd.f32 %v454_v54, %v374_v53  ;;  %vm531_vm7 = vcmp.eq.s32.totalorder %v1237_v46, %v1360_v59  ;;  %v566_v23 = vsel %vm530_vm6, %v1335_v39, 0.0 }
  0x70   : > { %v960_v57 = vpack.c.bf16 %v690_v42, %v689_v52  ;;  %v487_v31 = vadd.f32 %v455_v34, %v375_v41  ;;  %v567_v58 = vsel %vm531_vm7, %v1335_v39, 0.0  ;;  %vm639_vm8 = vcmp.eq.s32.totalorder %v1234_v45, %v1363_v3 }
  0x71   : > { %v598_v1 = vadd.f32 %v566_v23, %v486_v37  ;;  %vm640_vm9 = vcmp.eq.s32.totalorder %v1237_v46, %v1363_v3  ;;  %v675_v0 = vsel %vm639_vm8, %v1341_v43, 0.0  ;;  %vm322_vm10 = vcmp.eq.s32.totalorder %v1240_v47, %v1319_v24 }
  0x72   : > { %961 = vmatpush3.bf16.msra.mxu0 %v960_v57  ;;  %v599_v30 = vadd.f32 %v567_v58, %v487_v31  ;;  %v676_v4 = vsel %vm640_vm9, %v1341_v43, 0.0  ;;  %vm323_vm11 = vcmp.eq.s32.totalorder %v1243_v48, %v1319_v24  ;;  %v358_v5 = vsel %vm322_vm10, %v1310_v20, 0.0 }
  0x73   : > { %v707_v7 = vadd.f32 %v675_v0, %v598_v1  ;;  %v359_v45 = vsel %vm323_vm11, %v1310_v20, 0.0  ;;  %vm402_vm12 = vcmp.eq.s32.totalorder %v1240_v47, %v1322_v25  ;;  %vm403_vm13 = vcmp.eq.s32.totalorder %v1243_v48, %v1322_v25 }
  0x74   : > { %v708_v46 = vadd.f32 %v676_v4, %v599_v30  ;;  %v438_v8 = vsel %vm402_vm12, %v1313_v22, 0.0  ;;  %v439_v9 = vsel %vm403_vm13, %v1313_v22, 0.0  ;;  %vm514_vm14 = vcmp.eq.s32.totalorder %v1240_v47, %v1360_v59 }
  0x75   : > { %v470_v11 = vadd.f32 %v438_v8, %v358_v5  ;;  %v471_v12 = vadd.f32 %v439_v9, %v359_v45  ;;  %vm515_vm15 = vcmp.eq.s32.totalorder %v1243_v48, %v1360_v59  ;;  %v550_v38 = vsel %vm514_vm14, %v1335_v39, 0.0 }
  0x76   : > { %v962_v40 = vpack.c.bf16 %v708_v46, %v707_v7  ;;  %v551_v26 = vsel %vm515_vm15, %v1335_v39, 0.0  ;;  %vm623_vm0 = vcmp.eq.s32.totalorder %v1240_v47, %v1363_v3  ;;  %vm624_vm1 = vcmp.eq.s32.totalorder %v1243_v48, %v1363_v3 }
  0x77   : > { %v582_v14 = vadd.f32 %v550_v38, %v470_v11  ;;  %v583_v32 = vadd.f32 %v551_v26, %v471_v12  ;;  %v659_v33 = vsel %vm623_vm0, %v1341_v43, 0.0  ;;  %v660_v29 = vsel %vm624_vm1, %v1341_v43, 0.0 }
  0x78   : > { %963 = vmatprep.subr.bf16.mxu0 %v962_v40  ;;  %vm340_vm2 = vcmp.eq.s32.totalorder %v1246_v49, %v1319_v24  ;;  %vm341_vm3 = vcmp.eq.s32.totalorder %v1249_v50, %v1319_v24  ;;  %vm420_vm4 = vcmp.eq.s32.totalorder %v1246_v49, %v1322_v25  ;;  %vm421_vm5 = vcmp.eq.s32.totalorder %v1249_v50, %v1322_v25 }
  0x79   : > { %v691_v47 = vadd.f32 %v659_v33, %v582_v14  ;;  %v692_v48 = vadd.f32 %v660_v29, %v583_v32  ;;  %v376_v15 = vsel %vm340_vm2, %v1310_v20, 0.0  ;;  %v377_v19 = vsel %vm341_vm3, %v1310_v20, 0.0 }
  0x7a   : > { %v456_v21 = vsel %vm420_vm4, %v1313_v22, 0.0  ;;  %v457_v27 = vsel %vm421_vm5, %v1313_v22, 0.0  ;;  %vm532_vm6 = vcmp.eq.s32.totalorder %v1246_v49, %v1360_v59  ;;  %vm533_vm7 = vcmp.eq.s32.totalorder %v1249_v50, %v1360_v59 }
  0x7b   : > { %v964_v28 = vpack.c.bf16 %v692_v48, %v691_v47  ;;  %v488_v36 = vadd.f32 %v456_v21, %v376_v15  ;;  %v489_v51 = vadd.f32 %v457_v27, %v377_v19  ;;  %v568_v52 = vsel %vm532_vm6, %v1335_v39, 0.0 }
  0x7c   : > { %v569_v53 = vsel %vm533_vm7, %v1335_v39, 0.0  ;;  %vm641_vm8 = vcmp.eq.s32.totalorder %v1246_v49, %v1363_v3  ;;  %vm642_vm9 = vcmp.eq.s32.totalorder %v1249_v50, %v1363_v3  ;;  %vm324_vm10 = vcmp.eq.s32.totalorder %v1252_v55, %v1319_v24 }
  0x7d   : > { %965 = vmatpush3.bf16.msra.mxu0 %v964_v28  ;;  %v600_v41 = vadd.f32 %v568_v52, %v488_v36  ;;  %v601_v42 = vadd.f32 %v569_v53, %v489_v51  ;;  %v677_v54 = vsel %vm641_vm8, %v1341_v43, 0.0  ;;  %v678_v34 = vsel %vm642_vm9, %v1341_v43, 0.0 }
  0x7e   : > { %vm325_vm11 = vcmp.eq.s32.totalorder %v1255_v56, %v1319_v24  ;;  %v360_v37 = vsel %vm324_vm10, %v1310_v20, 0.0  ;;  %vm404_vm12 = vcmp.eq.s32.totalorder %v1252_v55, %v1322_v25  ;;  %vm405_vm13 = vcmp.eq.s32.totalorder %v1255_v56, %v1322_v25 }
  0x7f   : > { %v709_v49 = vadd.f32 %v677_v54, %v600_v41  ;;  %v710_v50 = vadd.f32 %v678_v34, %v601_v42  ;;  %v361_v23 = vsel %vm325_vm11, %v1310_v20, 0.0  ;;  %v440_v57 = vsel %vm404_vm12, %v1313_v22, 0.0 }
  0x80   : > { %v441_v31 = vsel %vm405_vm13, %v1313_v22, 0.0  ;;  %v472_v58 = vadd.f32 %v440_v57, %v360_v37  ;;  %vm516_vm14 = vcmp.eq.s32.totalorder %v1252_v55, %v1360_v59  ;;  %vm517_vm15 = vcmp.eq.s32.totalorder %v1255_v56, %v1360_v59 }
  0x81   : > { %v966_v1 = vpack.c.bf16 %v710_v50, %v709_v49  ;;  %v473_v0 = vadd.f32 %v441_v31, %v361_v23  ;;  %v552_v30 = vsel %vm516_vm14, %v1335_v39, 0.0  ;;  %v553_v4 = vsel %vm517_vm15, %v1335_v39, 0.0 }
  0x82   : > { %v584_v5 = vadd.f32 %v552_v30, %v472_v58  ;;  %vm625_vm0 = vcmp.eq.s32.totalorder %v1252_v55, %v1363_v3  ;;  %vm626_vm1 = vcmp.eq.s32.totalorder %v1255_v56, %v1363_v3  ;;  %vm342_vm2 = vcmp.eq.s32.totalorder %v1262_v60, %v1319_v24 }
  0x83   : > { %967 = vmatprep.subr.bf16.mxu0 %v966_v1  ;;  %v585_v7 = vadd.f32 %v553_v4, %v473_v0  ;;  %v661_v45 = vsel %vm625_vm0, %v1341_v43, 0.0  ;;  %v662_v46 = vsel %vm626_vm1, %v1341_v43, 0.0  ;;  %vm343_vm3 = vcmp.eq.s32.totalorder %v1265_v61, %v1319_v24 }
  0x84   : > { %v693_v8 = vadd.f32 %v661_v45, %v584_v5  ;;  %v378_v9 = vsel %vm342_vm2, %v1310_v20, 0.0  ;;  %v379_v55 = vsel %vm343_vm3, %v1310_v20, 0.0  ;;  %vm422_vm4 = vcmp.eq.s32.totalorder %v1262_v60, %v1322_v25 }
  0x85   : > { %v694_v56 = vadd.f32 %v662_v46, %v585_v7  ;;  %vm423_vm5 = vcmp.eq.s32.totalorder %v1265_v61, %v1322_v25  ;;  %v458_v11 = vsel %vm422_vm4, %v1313_v22, 0.0  ;;  %vm534_vm6 = vcmp.eq.s32.totalorder %v1262_v60, %v1360_v59 }
  0x86   : > { %v459_v12 = vsel %vm423_vm5, %v1313_v22, 0.0  ;;  %v490_v38 = vadd.f32 %v458_v11, %v378_v9  ;;  %vm535_vm7 = vcmp.eq.s32.totalorder %v1265_v61, %v1360_v59  ;;  %v570_v40 = vsel %vm534_vm6, %v1335_v39, 0.0 }
  0x87   : > { %v968_v26 = vpack.c.bf16 %v694_v56, %v693_v8  ;;  %v491_v14 = vadd.f32 %v459_v12, %v379_v55  ;;  %v571_v32 = vsel %vm535_vm7, %v1335_v39, 0.0  ;;  %vm643_vm8 = vcmp.eq.s32.totalorder %v1262_v60, %v1363_v3 }
  0x88   : > { %v602_v33 = vadd.f32 %v570_v40, %v490_v38  ;;  %vm644_vm9 = vcmp.eq.s32.totalorder %v1265_v61, %v1363_v3  ;;  %v679_v29 = vsel %vm643_vm8, %v1341_v43, 0.0  ;;  %vm326_vm10 = vcmp.eq.s32.totalorder %v1268_v62, %v1319_v24 }
  0x89   : > { %969 = vmatpush3.bf16.msra.mxu0 %v968_v26  ;;  %v603_v47 = vadd.f32 %v571_v32, %v491_v14  ;;  %v680_v48 = vsel %vm644_vm9, %v1341_v43, 0.0  ;;  %vm327_vm11 = vcmp.eq.s32.totalorder %v1271_v63, %v1319_v24  ;;  %v362_v15 = vsel %vm326_vm10, %v1310_v20, 0.0 }
  0x8a   : > { %v711_v19 = vadd.f32 %v679_v29, %v602_v33  ;;  %v363_v60 = vsel %vm327_vm11, %v1310_v20, 0.0  ;;  %vm406_vm12 = vcmp.eq.s32.totalorder %v1268_v62, %v1322_v25  ;;  %vm407_vm13 = vcmp.eq.s32.totalorder %v1271_v63, %v1322_v25 }
  0x8b   : > { %v712_v61 = vadd.f32 %v680_v48, %v603_v47  ;;  %v442_v21 = vsel %vm406_vm12, %v1313_v22, 0.0  ;;  %v443_v27 = vsel %vm407_vm13, %v1313_v22, 0.0  ;;  %vm518_vm14 = vcmp.eq.s32.totalorder %v1268_v62, %v1360_v59 }
  0x8c   : > { %v474_v28 = vadd.f32 %v442_v21, %v362_v15  ;;  %v475_v36 = vadd.f32 %v443_v27, %v363_v60  ;;  %vm519_vm15 = vcmp.eq.s32.totalorder %v1271_v63, %v1360_v59  ;;  %v554_v51 = vsel %vm518_vm14, %v1335_v39, 0.0 }
  0x8d   : > { %v970_v52 = vpack.c.bf16 %v712_v61, %v711_v19  ;;  %v555_v53 = vsel %vm519_vm15, %v1335_v39, 0.0  ;;  %vm627_vm0 = vcmp.eq.s32.totalorder %v1268_v62, %v1363_v3  ;;  %vm628_vm1 = vcmp.eq.s32.totalorder %v1271_v63, %v1363_v3 }
  0x8e   : > { %v586_v41 = vadd.f32 %v554_v51, %v474_v28  ;;  %v587_v42 = vadd.f32 %v555_v53, %v475_v36  ;;  %v663_v54 = vsel %vm627_vm0, %v1341_v43, 0.0  ;;  %v664_v34 = vsel %vm628_vm1, %v1341_v43, 0.0 }
  0x8f   : > { %971 = vmatprep.subr.bf16.mxu0 %v970_v52  ;;  %vm344_vm2 = vcmp.eq.s32.totalorder %v1278_v2, %v1319_v24  ;;  %vm345_vm3 = vcmp.eq.s32.totalorder %v1284_v6, %v1319_v24  ;;  %vm424_vm4 = vcmp.eq.s32.totalorder %v1278_v2, %v1322_v25  ;;  %vm425_vm5 = vcmp.eq.s32.totalorder %v1284_v6, %v1322_v25 }
  0x90   : > { %v695_v62 = vadd.f32 %v663_v54, %v586_v41  ;;  %v696_v63 = vadd.f32 %v664_v34, %v587_v42  ;;  %v380_v37 = vsel %vm344_vm2, %v1310_v20, 0.0  ;;  %v381_v49 = vsel %vm345_vm3, %v1310_v20, 0.0 }
  0x91   : > { %v460_v50 = vsel %vm424_vm4, %v1313_v22, 0.0  ;;  %v461_v23 = vsel %vm425_vm5, %v1313_v22, 0.0  ;;  %vm536_vm6 = vcmp.eq.s32.totalorder %v1278_v2, %v1360_v59  ;;  %vm537_vm7 = vcmp.eq.s32.totalorder %v1284_v6, %v1360_v59 }
  0x92   : > { %v972_v57 = vpack.c.bf16 %v696_v63, %v695_v62  ;;  %v492_v31 = vadd.f32 %v460_v50, %v380_v37  ;;  %v493_v58 = vadd.f32 %v461_v23, %v381_v49  ;;  %v572_v1 = vsel %vm536_vm6, %v1335_v39, 0.0 }
  0x93   : > { %v573_v0 = vsel %vm537_vm7, %v1335_v39, 0.0  ;;  %vm645_vm8 = vcmp.eq.s32.totalorder %v1278_v2, %v1363_v3  ;;  %vm646_vm9 = vcmp.eq.s32.totalorder %v1284_v6, %v1363_v3  ;;  %vm328_vm10 = vcmp.eq.s32.totalorder %v1292_v10, %v1319_v24 }
  0x94   : > { %973 = vmatpush3.bf16.msra.mxu0 %v972_v57  ;;  %v604_v30 = vadd.f32 %v572_v1, %v492_v31  ;;  %v605_v4 = vadd.f32 %v573_v0, %v493_v58  ;;  %v681_v5 = vsel %vm645_vm8, %v1341_v43, 0.0  ;;  %v682_v7 = vsel %vm646_vm9, %v1341_v43, 0.0 }
  0x95   : > { %vm329_vm11 = vcmp.eq.s32.totalorder %v1299_v16, %v1319_v24  ;;  %v364_v45 = vsel %vm328_vm10, %v1310_v20, 0.0  ;;  %vm408_vm12 = vcmp.eq.s32.totalorder %v1292_v10, %v1322_v25  ;;  %vm409_vm13 = vcmp.eq.s32.totalorder %v1299_v16, %v1322_v25 }
  0x96   : > { %v713_v2 = vadd.f32 %v681_v5, %v604_v30  ;;  %v714_v6 = vadd.f32 %v682_v7, %v605_v4  ;;  %v365_v46 = vsel %vm329_vm11, %v1310_v20, 0.0  ;;  %v444_v8 = vsel %vm408_vm12, %v1313_v22, 0.0 }
  0x97   : > { %v445_v9 = vsel %vm409_vm13, %v1313_v22, 0.0  ;;  %v476_v55 = vadd.f32 %v444_v8, %v364_v45  ;;  %vm520_vm14 = vcmp.eq.s32.totalorder %v1292_v10, %v1360_v59  ;;  %vm521_vm15 = vcmp.eq.s32.totalorder %v1299_v16, %v1360_v59 }
  0x98   : > { %v974_v56 = vpack.c.bf16 %v714_v6, %v713_v2  ;;  %v477_v11 = vadd.f32 %v445_v9, %v365_v46  ;;  %v556_v12 = vsel %vm520_vm14, %v1335_v39, 0.0  ;;  %v557_v38 = vsel %vm521_vm15, %v1335_v39, 0.0 }
  0x99   : > { %v588_v40 = vadd.f32 %v556_v12, %v476_v55  ;;  %vm629_vm0 = vcmp.eq.s32.totalorder %v1292_v10, %v1363_v3  ;;  %vm630_vm1 = vcmp.eq.s32.totalorder %v1299_v16, %v1363_v3  ;;  %vm346_vm2 = vcmp.eq.s32.totalorder %v1302_v17, %v1319_v24 }
  0x9a   : > { %975 = vmatprep.subr.bf16.mxu0 %v974_v56  ;;  %v589_v26 = vadd.f32 %v557_v38, %v477_v11  ;;  %v665_v14 = vsel %vm629_vm0, %v1341_v43, 0.0  ;;  %v666_v32 = vsel %vm630_vm1, %v1341_v43, 0.0  ;;  %vm347_vm3 = vcmp.eq.s32.totalorder %v1305_v18, %v1319_v24 }
  0x9b   : > { %v697_v33 = vadd.f32 %v665_v14, %v588_v40  ;;  %v382_v29 = vsel %vm346_vm2, %v1310_v20, 0.0  ;;  %v383_v10 = vsel %vm347_vm3, %v1310_v20, 0.0  ;;  %vm426_vm4 = vcmp.eq.s32.totalorder %v1302_v17, %v1322_v25 }
  0x9c   : > { %v698_v16 = vadd.f32 %v666_v32, %v589_v26  ;;  %vm427_vm5 = vcmp.eq.s32.totalorder %v1305_v18, %v1322_v25  ;;  %v462_v47 = vsel %vm426_vm4, %v1313_v22, 0.0  ;;  %vm538_vm6 = vcmp.eq.s32.totalorder %v1302_v17, %v1360_v59 }
  0x9d   : > { %v463_v48 = vsel %vm427_vm5, %v1313_v22, 0.0  ;;  %v494_v15 = vadd.f32 %v462_v47, %v382_v29  ;;  %vm539_vm7 = vcmp.eq.s32.totalorder %v1305_v18, %v1360_v59  ;;  %v574_v19 = vsel %vm538_vm6, %v1335_v39, 0.0 }
  0x9e   : > { %v976_v60 = vpack.c.bf16 %v698_v16, %v697_v33  ;;  %v495_v61 = vadd.f32 %v463_v48, %v383_v10  ;;  %v575_v21 = vsel %vm539_vm7, %v1335_v39, 0.0  ;;  %vm647_vm8 = vcmp.eq.s32.totalorder %v1302_v17, %v1363_v3 }
  0x9f   : > { %v606_v27 = vadd.f32 %v574_v19, %v494_v15  ;;  %vm648_vm9 = vcmp.eq.s32.totalorder %v1305_v18, %v1363_v3  ;;  %v683_v28 = vsel %vm647_vm8, %v1341_v43, 0.0  ;;  %vm330_vm10 = vcmp.eq.s32.totalorder %v1330_v35, %v1319_v24 }
  0xa0   : > { %977 = vmatpush3.bf16.msra.mxu0 %v976_v60  ;;  %v607_v36 = vadd.f32 %v575_v21, %v495_v61  ;;  %v684_v51 = vsel %vm648_vm9, %v1341_v43, 0.0  ;;  %vm331_vm11 = vcmp.eq.s32.totalorder %v1344_v44, %v1319_v24  ;;  %v366_v52 = vsel %vm330_vm10, %v1310_v20, 0.0 }
  0xa1   : > { %v715_v53 = vadd.f32 %v683_v28, %v606_v27  ;;  %v367_v17 = vsel %vm331_vm11, %v1310_v20, 0.0  ;;  %vm410_vm12 = vcmp.eq.s32.totalorder %v1330_v35, %v1322_v25  ;;  %vm411_vm13 = vcmp.eq.s32.totalorder %v1344_v44, %v1322_v25 }
  0xa2   : > { %v716_v18 = vadd.f32 %v684_v51, %v607_v36  ;;  %v446_v41 = vsel %vm410_vm12, %v1313_v22, 0.0  ;;  %v447_v42 = vsel %vm411_vm13, %v1313_v22, 0.0  ;;  %vm522_vm14 = vcmp.eq.s32.totalorder %v1330_v35, %v1360_v59 }
  0xa3   : > { %v478_v24 = vadd.f32 %v446_v41, %v366_v52  ;;  %v479_v54 = vadd.f32 %v447_v42, %v367_v17  ;;  %vm523_vm15 = vcmp.eq.s32.totalorder %v1344_v44, %v1360_v59  ;;  %v558_v20 = vsel %vm522_vm14, %v1335_v39, 0.0 }
  0xa4   : > { %v978_v34 = vpack.c.bf16 %v716_v18, %v715_v53  ;;  %v559_v25 = vsel %vm523_vm15, %v1335_v39, 0.0  ;;  %vm631_vm0 = vcmp.eq.s32.totalorder %v1330_v35, %v1363_v3  ;;  %vm632_vm1 = vcmp.eq.s32.totalorder %v1344_v44, %v1363_v3 }
  0xa5   : > { %v590_v22 = vadd.f32 %v558_v20, %v478_v24  ;;  %v591_v62 = vadd.f32 %v559_v25, %v479_v54  ;;  %v667_v63 = vsel %vm631_vm0, %v1341_v43, 0.0  ;;  %v668_v37 = vsel %vm632_vm1, %v1341_v43, 0.0 }
  0xa6   : > { %979 = vmatprep.subr.bf16.mxu0 %v978_v34 }
  0xa7   : > { %v699_v59 = vadd.f32 %v667_v63, %v590_v22  ;;  %v700_v49 = vadd.f32 %v668_v37, %v591_v62 }
  0xa9   : > { %v980_v50 = vpack.c.bf16 %v700_v49, %v699_v59 }
  0xab   : > { %981 = vmatpush3.bf16.msra.mxu0 %v980_v50 }
  0xae   : > { %786 = vmatmul.mubr.f32.vlgmr.msra.gmra.mrb[0].mxu0 %v1191_v13 }
 0x181   : > { %v947_v35 = vpop.f32.mrb[0].mxu0 }
 0x182   : > { %v948_v39 = vpop.f32.mrb[1].mxu0 }
 0x183   : > { %v949_v44 = vadd.f32 %v948_v39, %v947_v35 }
 0x185   : > { %791 = vst [vmem:[%s221_s5] sm:$0xf] %v949_v44 }
 0x186 PF: > { %s14_s16 = sadd.s32 1, %s1095_s16   ;;  %s1772_s12 = smov %s1087_s14 }
 0x187   : > { %p11_p4 = scmp.ge.s32.totalorder %s14_s16, 6   ;;  %s1773_s13 = smov %s1091_s15 }
 0x188   : > { %s1774_s14 = smov %s1777_s18  ;;  %s1775_s15 = smov %s1781_s19 }
 0x189   :  { %13 = sbr.rel (!%p11_p4) target bundleno = 3 (0x3), region = 70 }
 0x190   :  { %819 = vsyncpa [#allocation3], 1 }
 0x191   :  { %821 = vsyncpa [#allocation3 + $0x1], 1 }

// kernel: _lambda_.7
= control target key start
LH: loop header
LB: loop body
LE: loop exit
PB: predicated region body
PF: predicated region fallthrough
CT: control target
= control target key end

     0   :  { %s706_s20 = smov 0   ;;  %s708_s21 = smov 0   ;;  %s755_s0 = inlined_call_operand.vmem [shape: bf16[2,36,256], index: 0, kind: input, shape index: {}]   ;;  %s756_s1 = inlined_call_operand.vmem [shape: bf16[16,36], index: 1, kind: input, shape index: {}]   ;;  %s757_s2 = inlined_call_operand.vmem [shape: f32[16,1], index: 2, kind: input, shape index: {}]   ;;  %s758_s3 = inlined_call_operand.vmem [shape: f32[1,16], index: 3, kind: input, shape index: {}]   ;;  %s759_s4 = inlined_call_operand.<no memory space> [shape: f32[1,1], index: 4, kind: input, shape index: {}]   ;;  %s760_s5 = inlined_call_operand.vmem [shape: f32[2,1,256], index: 5, kind: output, shape index: {}]  }
   0x1   :  { %v10_v0 = vstv %s759_s4  ;;  %s710_s22 = smov 0  }
   0x2   :  { %11 = vst [vmem:[#allocation2] sm:$0x1] %v10_v0 }
   0x3 LB: > { %s29_s4 = sadd.s32 1, %s664_s21  ;;  %p578_p0 = scmp.ge.s32.totalorder %s668_s22, 1  ;;  %s668_s22 = sphi %s710_s22, %s17_s22   ;;  %s664_s21 = sphi %s708_s21, %s762_s21   ;;  %s660_s20 = sphi %s706_s20, %s761_s20  }
   0x4   : > { %p31_p1 = scmp.ge.s32.totalorder %s29_s4, 2  ;;  %p210_p2 = scmp.lt.s32.totalorder %s668_s22, 3 }
   0x6   : > { %s764_s4 = smov (%p31_p1, %s29_s4), 0  ;;  %p211_p3 = pnand %p578_p0, %p210_p2 }
   0x7   : > { %p246_p4 = scmp.lt.s32.totalorder (!%p211_p3), %s660_s20, 1  ;;  %v670_v1 = vmov (!%p211_p3), 0   ;;  %v272_v2 = vld [vmem:[%s757_s2] sm:$0xff] (!%p211_p3)  ;;  %v273_v3 = vld [vmem:[%s757_s2 + $0x8] sm:$0xff] (!%p211_p3)  ;;  %vm318_vm0 = vcmask (!%p211_p3), 1041408   ;;  %vm314_vm1 = vcmask (!%p211_p3), 293888   ;;  %v379_v32 = vlaneseq (!%p211_p3) }
   0x8   : > { %214 = sbr.rel (%p211_p3) target bundleno = 505 (0x1f9), region = 40  ;;  %357 = vmatprep.mubr.bf16.mxu0 (!%p211_p3), %v670_v1  ;;  %627 = vset.pattern.permute.xlu0 (!%p211_p3), %v670_v1  ;;  %v637_v12 = vld [vmem:[%s756_s1] sm:$0xff] (!%p211_p3)   ;;  %v671_v13 = vmov (!%p211_p3), 0.0   ;;  %vm383_vm2 = vcmask (!%p211_p3), 130048   ;;  %v672_v47 = vmov (!%p211_p3), 1966171168  }
   0x9   : > { %276 = vperm.xlu0 (!%p211_p3), %627, %v272_v2   ;;  %628 = vset.pattern.permute.xlu1 (!%p211_p3), %v670_v1  ;;  %v373_v14 = vld [vmem:[#allocation2] sm:$0x1] (!%p211_p3)  ;;  %v380_v33 = vshrl.u32 (!%p211_p3), %v379_v32, 7  ;;  %v474_v48 = vunpack.c.l.s4 (!%p211_p3), %v672_v47  ;;  %vm490_vm3 = vcmp.lt.s32.totalorder (!%p211_p3), %v379_v32, 256 }
   0xa   : > { %451 = vmatprep.mubr.f32.mxu1 (!%p211_p3), %v671_v13  ;;  %376 = vperm.xlu1 (!%p211_p3), %628, %v373_v14   ;;  %v372_v31 = vld [vmem:[%s758_s3] sm:$0x1] (!%p211_p3) }
   0xb   : > { %v381_v34 = vsub.s32 (!%p211_p3), 0, %v380_v33  ;;  %v475_v49 = vunpack.c.0.s8 (!%p211_p3), %v474_v48 }
   0xd   : > { %281 = vperm.xlu0 (!%p211_p3), %627, %v273_v3   ;;  %v478_v51 = vsub.s32 (!%p211_p3), %v475_v49, %v380_v33 }
   0xf   : > { %s766_s20 = smov (!%p246_p4, %s660_s20), 1 }
  0x10   : > { %s599_s27 = smul.u32 40, %s766_s20  ;;  %s580_s10 = sshll.u32 %s766_s20, 1 }
  0x11   : > { %s262_s13 = scalar_lea.vmem %s760_s5, %s580_s10 }
  0x12   : > { %s253_s30 = scalar_lea.vmem %s755_s0, %s599_s27 }
  0x13   : > { %v629_v4 = vld [vmem:[%s253_s30 + $0x4] ss:$8 sps:$4 sm:$0xff]   ;;  %v631_v5 = vld [vmem:[%s253_s30] ss:$8 sps:$4 sm:$0xff]   ;;  %v632_v6 = vld [vmem:[%s253_s30 + $0x14] ss:$8 sps:$4 sm:$0xff]  }
  0x14   : > { %325 = vmatprep.subr.bf16.mxu0 %v629_v4  ;;  %v271_v7 = vld [vmem:[%s253_s30 + $0x20] sm:$0x33]  ;;  %v634_v8 = vld [vmem:[%s253_s30 + $0x10] ss:$8 sps:$4 sm:$0xff]  }
  0x15   : > { %326 = vmatpush1.bf16.msra.mxu0 %v631_v5  ;;  %v587_v9 = vcombine.high %v271_v7, %v271_v7  ;;  %v586_v10 = vcombine.low %v271_v7, %v271_v7 }
  0x16   : > { %327 = vmatprep.subr.bf16.mxu0 %v632_v6 }
  0x17   : > { %v320_v11 = vsel %vm318_vm0, %v586_v10, 0 }
  0x19   : > { %328 = vmatpush1.bf16.msra.mxu0 %v634_v8 }
  0x1a   : > { %588 = vmatprep.subr.msk.bf16.mxu0 %vm318_vm0, %v587_v9 }
  0x1d   : > { %330 = vmatpush1.bf16.msra.mxu0 %v320_v11 }
  0x20   : > { %589 = vmatmul.mubr.msk.bf16.vlgmr.msra.gmra.mrb[0].mxu0 %vm314_vm1, %v637_v12 }
  0x88   : > { %v277_v15 = vpop.permute.xlu0 %276 }
  0x89   : > { %v377_v35 = vpop.permute.xlu1 %376 }
  0x8a   : > { %v382_v36 = vrot.slane %v377_v35, %v381_v34 }
  0x8c   : > { %v282_v19 = vpop.permute.xlu0 %281 }
  0xf3   : > { %v359_v16 = vpop.f32.mrb[0].mxu0 }
  0xf4   : > { %v360_v17 = vadd.f32 %v359_v16, %v277_v15  ;;  %v361_v18 = vpop.f32.mrb[1].mxu0 }
  0xf5   : > { %v362_v20 = vadd.f32 %v361_v18, %v277_v15  ;;  %v363_v21 = vpop.f32.mrb[2].mxu0 }
  0xf6   : > { %v364_v22 = vadd.f32 %v363_v21, %v282_v19  ;;  %v365_v23 = vpop.f32.mrb[3].mxu0  ;;  %v368_v25 = vmax.f32 %v360_v17, 0.0 }
  0xf7   : > { %v366_v24 = vadd.f32 %v365_v23, %v282_v19  ;;  %v369_v27 = vmax.f32 %v362_v20, 0.0 }
  0xf8   : > { %v370_v26 = vmax.f32 %v364_v22, 0.0 }
  0xf9   : > { %v371_v28 = vmax.f32 %v366_v24, 0.0 }
  0xfa   : > { %v597_v29 = vpack.c.bf16 %v370_v26, %v368_v25 }
  0xfb   : > { %v595_v30 = vpack.c.bf16 %v371_v28, %v369_v27 }
  0xfd   : > { %596 = vmatprep.subr.bf16.mxu1 %v595_v30 }
  0xfe   : > { %598 = vmatpush1.bf16.msra.mxu1 %v597_v29 }
 0x101   : > { %590 = vmatmul.mubr.msk.f32.vlgmr.msra.gmra.mrb[0].mxu1 %vm383_vm2, %v372_v31 }
 0x1d4   : > { %v453_v37 = vpop.f32.mrb[0].mxu1 }
 0x1d5   : > { %v454_v38 = vadd.f32 %v453_v37, %v382_v36  ;;  %v455_v39 = vpop.f32.mrb[1].mxu1 }
 0x1d6   : > { %v456_v40 = vadd.f32 %v455_v39, %v382_v36 }
 0x1d7   : > { %v591_v41 = vmul.f32 -1.442695, %v454_v38 }
 0x1d8   : > { %v592_v42 = vmul.f32 -1.442695, %v456_v40 }
 0x1d9   : > { %638 = vpow2.f32 %v591_v41 }
 0x1da   : > { %640 = vpow2.f32 %v592_v42 }
 0x1e3   : > { %v639_v43 = vpop.eup %638 }
 0x1e4   : > { %v641_v44 = vpop.eup %640  ;;  %v464_v45 = vadd.f32 1.0, %v639_v43 }
 0x1e5   : > { %v465_v46 = vadd.f32 1.0, %v641_v44 }
 0x1e6   : > { %642 = vrcp.f32 %v464_v45 }
 0x1e7   : > { %644 = vrcp.f32 %v465_v46 }
 0x1f0   : > { %v643_v50 = vpop.eup %642 }
 0x1f1   : > { %v645_v52 = vpop.eup %644 }
 0x1f2   : > { %v472_v53 = vcombine.low %v643_v50, %v645_v52 }
 0x1f4   : > { %v479_v54 = vrot.slane %v472_v53, %v478_v51 }
 0x1f6   : > { %v486_v55 = vrot.slane %v479_v54, %v478_v51 }
 0x1f8   : > { %492 = vst.msk [vmem:[%s262_s13] sm:$0x3] %vm490_vm3, %v486_v55 }
 0x1f9 PF: > { %s17_s22 = sadd.s32 1, %s668_s22   ;;  %s761_s20 = smov %s664_s21 }
 0x1fa   : > { %p14_p5 = scmp.ge.s32.totalorder %s17_s22, 4   ;;  %s762_s21 = smov %s764_s4 }
 0x1fc   :  { %16 = sbr.rel (!%p14_p5) target bundleno = 3 (0x3), region = 70 }

</bundles_post_ra>
